<compile_context>
chip_gen: v7x
topology: tpu7x:2x2x1
jax: 0.10.0
libtpu: 0.0.40
codegen_flags: <defaults>
</compile_context>

<pallas_src>
import functools

import numpy as np
import jax
import jax.numpy as jnp
from jax import lax
from jax.experimental import pallas as pl
from jax.experimental.pallas import tpu as pltpu


# ----------------------------------------------------------------------------
# Deterministic "config" (the module has no learned weights; __init__ only
# stores thresholds and per-variable affine transforms).
# ----------------------------------------------------------------------------
T_B = 0.3          # beta threshold
T_D = 0.7          # distance threshold
X_SIZE = 3         # config['output model']['x size']

VAR_TRANSFORM = {
    'particle_pt':     {'mean': 1.00, 'std': 0.50},
    'particle_eta':    {'mean': 0.00, 'std': 1.20},
    'particle_xhat':   {'mean': 0.00, 'std': 1.00},
    'particle_yhat':   {'mean': 0.00, 'std': 1.00},
    'particle_prod_x': {'mean': 0.10, 'std': 10.0},
    'particle_prod_y': {'mean': -0.2, 'std': 10.0},
    'particle_prod_z': {'mean': 0.30, 'std': 25.0},
}

_NEG = -1e30   # finite "-inf" for masked maxima (padding / already-assigned)


def condnet_kernel(beta_ref, mask_ref, x_ref, feat_ref, pos_ref, cls_ref, chg_ref,
                   is_cond_ref, clust_ref, eta_ref, pt_ref, xhat_ref, yhat_ref,
                   px_ref, py_ref, pz_ref, prodx_ref, prody_ref, prodz_ref,
                   cls_idx_ref, chg_idx_ref, *, t_b, t_d, vt):
    beta = beta_ref[...]                        # [TB, Np]  lane-dense
    mask = mask_ref[...]                        # [TB, Np]  1 = real node
    TB, Np = beta.shape

    def plane(ref, k):                          # static, 128-aligned lane slice
        return ref[:, k * Np:(k + 1) * Np]

    x_nplanes = x_ref.shape[1] // Np
    x_planes = [plane(x_ref, k) for k in range(x_nplanes)]     # SoA cluster space
    node_idx = lax.broadcasted_iota(jnp.int32, (TB, Np), 1)
    t_d2 = t_d * t_d

    # ---- find_condensation_points: early-terminating fix-point loop ---------
    # Loop while any unassigned real node has beta >= t_b (PyTorch early break).
    def cond_fn(carry):
        _, assigned, _, _ = carry
        open_beta = jnp.where((mask > 0.0) & (assigned == 0.0), beta, _NEG)
        return jnp.max(open_beta) >= t_b

    def body_fn(carry):
        it, assigned, is_cond, clust = carry
        real = mask > 0.0
        avail = real & (assigned == 0.0)
        beta_eff = jnp.where(avail, beta, _NEG)

        max_beta = jnp.max(beta_eff, axis=1, keepdims=True)                 # [TB,1]
        cand = jnp.where(avail & (beta_eff == max_beta), node_idx, jnp.int32(Np))
        max_idx = jnp.min(cand, axis=1, keepdims=True)                      # first max
        at_max = node_idx == max_idx                                        # one-hot
        one_hot = at_max.astype(jnp.float32)
        thr = max_beta >= t_b                                               # [TB,1]

        # squared distance to the condensation candidate, SoA FMAs (no sqrt)
        dist2 = jnp.zeros((TB, Np), jnp.float32)
        for xk in x_planes:
            mxk = jnp.sum(xk * one_hot, axis=1, keepdims=True)              # x[argmax]
            d = xk - mxk
            dist2 = dist2 + d * d

        is_cond = jnp.where(at_max & thr, 1.0, is_cond)
        selected = (dist2 <= t_d2) & thr & real
        # cluster idx stored as f32 of the iteration counter (exact for < 2^24)
        clust = jnp.where(selected, it.astype(jnp.float32), clust)
        assigned = jnp.where(selected, 1.0, assigned)
        return it + 1, assigned, is_cond, clust

    init = (jnp.int32(0),
            jnp.zeros((TB, Np), jnp.float32),          # assigned
            jnp.zeros((TB, Np), jnp.float32),          # is cond point
            -jnp.ones((TB, Np), jnp.float32))          # cluster idx
    _, _, is_cond, clust = lax.while_loop(cond_fn, body_fn, init)

    is_cond_ref[...] = is_cond
    clust_ref[...] = clust

    # ---- undo_scaling (dense, lane-dense planes; all constants are scalars) --
    f0 = plane(feat_ref, 0)
    f1 = plane(feat_ref, 1)
    f2 = plane(feat_ref, 2)
    f3 = plane(feat_ref, 3)
    pt = jnp.exp(vt['particle_pt']['std'] * f0 + vt['particle_pt']['mean'])
    eta = vt['particle_eta']['std'] * f1 + vt['particle_eta']['mean']
    xhat = vt['particle_xhat']['std'] * f2 + vt['particle_xhat']['mean']
    yhat = vt['particle_yhat']['std'] * f3 + vt['particle_yhat']['mean']
    pt_ref[...] = pt
    eta_ref[...] = eta
    xhat_ref[...] = xhat
    yhat_ref[...] = yhat

    # px = pt*cos(atan2(y,x)), py = pt*sin(atan2(y,x)); guard r==0 (atan2(0,0)=0)
    r2 = xhat * xhat + yhat * yhat
    nz = r2 > 0.0
    inv_r = lax.rsqrt(jnp.where(nz, r2, 1.0))
    px_ref[...] = pt * jnp.where(nz, xhat * inv_r, 1.0)
    py_ref[...] = pt * jnp.where(nz, yhat * inv_r, 0.0)
    # pz = pt / tan(2*atan(-exp(eta))) == pt * sinh(eta), reusing one exp
    eeta = jnp.exp(eta)
    pz_ref[...] = pt * 0.5 * (eeta - 1.0 / eeta)

    prodx_ref[...] = plane(pos_ref, 0) * vt['particle_prod_x']['std'] + vt['particle_prod_x']['mean']
    prody_ref[...] = plane(pos_ref, 1) * vt['particle_prod_y']['std'] + vt['particle_prod_y']['mean']
    prodz_ref[...] = plane(pos_ref, 2) * vt['particle_prod_z']['std'] + vt['particle_prod_z']['mean']

    # ---- first-occurrence argmax over class / charge logits (unrolled, VPU) --
    def first_argmax(ref):
        n_planes = ref.shape[1] // Np
        best_val = plane(ref, 0)
        best_idx = jnp.zeros((TB, Np), jnp.int32)
        for k in range(1, n_planes):
            v = plane(ref, k)
            better = v > best_val
            best_val = jnp.where(better, v, best_val)
            best_idx = jnp.where(better, jnp.int32(k), best_idx)
        return best_idx

    cls_idx_ref[...] = first_argmax(cls_ref)
    chg_idx_ref[...] = first_argmax(chg_ref)


def _round_up(v, m):
    return (v + m - 1) // m * m


def condnet_inference(beta, x, mask, feat, pos, cls, chg,
                      *, t_b=T_B, t_d=T_D, var_transform=VAR_TRANSFORM):
    B, N = beta.shape
    TB = 8                                  # sublane block of graphs per grid step
    Bp = _round_up(B, TB)
    Np = _round_up(N, 128)                  # lane axis, tile aligned

    def pad2(a):                            # [B, N] -> [Bp, Np]
        return jnp.pad(a.astype(jnp.float32), ((0, Bp - B), (0, Np - N)))

    def to_planes(a):                       # [B, N, K] -> [Bp, K*Np] (SoA planes)
        K = a.shape[-1]
        at = jnp.transpose(a.astype(jnp.float32), (0, 2, 1))          # [B, K, N]
        at = jnp.pad(at, ((0, Bp - B), (0, 0), (0, Np - N)))          # [Bp, K, Np]
        return at.reshape(Bp, K * Np)

    beta_p = pad2(beta)
    mask_p = pad2(mask)
    x_p = to_planes(x)
    feat_p = to_planes(feat)
    pos_p = to_planes(pos)
    cls_p = to_planes(cls)
    chg_p = to_planes(chg)

    grid = (Bp // TB,)

    def in_spec(arr):
        w = arr.shape[1]
        return pl.BlockSpec((TB, w), lambda i: (i, 0))

    out_spec = pl.BlockSpec((TB, Np), lambda i: (i, 0))
    f32 = jnp.float32
    out_shape = tuple([jax.ShapeDtypeStruct((Bp, Np), f32)] * 12
                      + [jax.ShapeDtypeStruct((Bp, Np), jnp.int32)] * 2)

    kernel = functools.partial(condnet_kernel, t_b=float(t_b), t_d=float(t_d),
                               vt=var_transform)
    outs = pl.pallas_call(
        kernel,
        out_shape=out_shape,
        grid=grid,
        in_specs=[in_spec(a) for a in (beta_p, mask_p, x_p, feat_p, pos_p, cls_p, chg_p)],
        out_specs=tuple([out_spec] * 14),
        compiler_params=pltpu.CompilerParams(dimension_semantics=("parallel",)),
    )(beta_p, mask_p, x_p, feat_p, pos_p, cls_p, chg_p)

    (is_cond, clust, eta, pt, xh, yh, px, py, pz,
     prx, pry, prz, cls_idx, chg_idx) = outs

    s = (slice(0, B), slice(0, N))
    is_cond = is_cond[s]
    clust = clust[s]
    eta = eta[s]
    pt = pt[s]
    xh = xh[s]
    yh = yh[s]
    pxpypz = jnp.stack([px[s], py[s], pz[s]], axis=-1)
    prod_pos = jnp.stack([prx[s], pry[s], prz[s]], axis=-1)
    cls_idx = cls_idx[s]
    chg_idx = chg_idx[s]

    # TODO(synk): atan2 for phi kept outside the kernel (no guaranteed Mosaic
    # lowering); cos/sin(phi) were folded into px/py in-kernel via xhat/r, yhat/r.
    phi = jnp.arctan2(yh, xh)
    nump = jnp.sum(is_cond, axis=1)          # dgl.sum_nodes(g, 'is cond point')

    return {
        'is_cond_point': is_cond,
        'cluster_idx': clust,
        'predicted_num_particles': nump,
        'eta': eta, 'phi': phi, 'pt': pt,
        'pxpypz': pxpypz, 'prod_pos': prod_pos,
        'class': cls_idx, 'charge': chg_idx,
    }


if __name__ == "__main__":
    B, N, C, Q = 2, 16, 5, 3
    key = jax.random.PRNGKey(0)
    ks = jax.random.split(key, 6)

    beta = jax.random.uniform(ks[0], (B, N), jnp.float32)           # sigmoid-like
    x = jax.random.normal(ks[1], (B, N, X_SIZE), jnp.float32)       # cluster space
    mask = jnp.ones((B, N), jnp.float32).at[1, N - 3:].set(0.0)     # pad 3 nodes
    feat = jax.random.normal(ks[2], (B, N, 4), jnp.float32)         # pt_eta_xhat_yhat_pred
    pos = jax.random.normal(ks[3], (B, N, 3), jnp.float32)          # pos pred
    cls = jax.random.normal(ks[4], (B, N, C), jnp.float32)          # class pred
    chg = jax.random.normal(ks[5], (B, N, Q), jnp.float32)          # charge pred

    out = condnet_inference(beta, x, mask, feat, pos, cls, chg)
    out = jax.tree_util.tree_map(jax.block_until_ready, out)

    # ---- numpy reference of the condensation fix-point (same tie-break) ----
    beta_np = np.asarray(beta)
    x_np = np.asarray(x)
    mask_np = np.asarray(mask)

    def ref_condense(beta_a, x_a, mask_a, t_b, t_d):
        Bn, Nn = beta_a.shape
        is_c = np.zeros((Bn, Nn), np.float32)
        cl = -np.ones((Bn, Nn), np.float32)
        assigned = np.zeros((Bn, Nn), bool)
        real = mask_a > 0
        it = 0
        while True:
            avail = real & ~assigned
            if not np.any(avail & (beta_a >= t_b)):
                break
            for b in range(Bn):
                eff = np.where(avail[b], beta_a[b], np.float32(_NEG)).astype(np.float32)
                j = int(np.argmax(eff))
                if eff[j] >= t_b:
                    is_c[b, j] = 1.0
                    d2 = ((x_a[b] - x_a[b, j]) ** 2).sum(-1)
                    sel = (d2 <= t_d * t_d) & real[b]
                    cl[b, sel] = it
                    assigned[b, sel] = True
            it += 1
        return is_c, cl

    ref_ic, ref_cl = ref_condense(beta_np, x_np, mask_np, T_B, T_D)
    assert np.array_equal(ref_ic, np.asarray(out['is_cond_point']))
    assert np.array_equal(ref_cl, np.asarray(out['cluster_idx']))
    assert np.array_equal(np.argmax(np.asarray(cls), axis=-1), np.asarray(out['class']))
    assert np.array_equal(np.argmax(np.asarray(chg), axis=-1), np.asarray(out['charge']))

    # ---- undo_scaling reference (float64, original torch formulas) ----------
    vt = VAR_TRANSFORM
    feat64 = np.asarray(feat, np.float64)
    pt_r = np.exp(vt['particle_pt']['std'] * feat64[..., 0] + vt['particle_pt']['mean'])
    eta_r = vt['particle_eta']['std'] * feat64[..., 1] + vt['particle_eta']['mean']
    xh_r = vt['particle_xhat']['std'] * feat64[..., 2] + vt['particle_xhat']['mean']
    yh_r = vt['particle_yhat']['std'] * feat64[..., 3] + vt['particle_yhat']['mean']
    phi_r = np.arctan2(yh_r, xh_r)
    px_r = pt_r * np.cos(phi_r)
    py_r = pt_r * np.sin(phi_r)
    theta_r = 2.0 * np.arctan(-np.exp(eta_r))
    pz_r = pt_r / np.tan(theta_r)
    np.testing.assert_allclose(np.asarray(out['pt']), pt_r, rtol=1e-3, atol=1e-3)
    np.testing.assert_allclose(np.asarray(out['eta']), eta_r, rtol=1e-3, atol=1e-3)
    np.testing.assert_allclose(np.asarray(out['pxpypz']),
                               np.stack([px_r, py_r, pz_r], axis=-1),
                               rtol=1e-3, atol=1e-3)

    # ---- create_particles: ragged data-dependent gather (numpy glue) --------
    is_cond_np = np.asarray(out['is_cond_point']) > 0
    sel = is_cond_np.reshape(-1)
    particle_pt = np.asarray(out['pt']).reshape(-1)[sel]
    particle_eta = np.asarray(out['eta']).reshape(-1)[sel]
    particle_phi = np.asarray(out['phi']).reshape(-1)[sel]
    particle_pxpypz = np.asarray(out['pxpypz']).reshape(-1, 3)[sel]
    particle_pos = np.asarray(out['prod_pos']).reshape(-1, 3)[sel]
    particle_class = np.asarray(out['class']).reshape(-1)[sel]
    particle_charge = np.asarray(out['charge']).reshape(-1)[sel]
    n_pred = np.asarray(out['predicted_num_particles'])

    assert particle_pt.shape[0] == int(n_pred.sum())
    assert np.all(np.isfinite(particle_pxpypz))
    assert np.all(np.isfinite(particle_pos))

    print("KERNEL_OK")
</pallas_src>

<mosaic_0001>
module attributes {stable_mosaic.version = 11 : i64} {
  func.func @condnet_kernel(%arg0: i32, %arg1: memref<8x128xf32, #tpu.memory_space<vmem>>, %arg2: memref<8x128xf32, #tpu.memory_space<vmem>>, %arg3: memref<8x384xf32, #tpu.memory_space<vmem>>, %arg4: memref<8x512xf32, #tpu.memory_space<vmem>>, %arg5: memref<8x384xf32, #tpu.memory_space<vmem>>, %arg6: memref<8x640xf32, #tpu.memory_space<vmem>>, %arg7: memref<8x384xf32, #tpu.memory_space<vmem>>, %arg8: memref<8x128xf32, #tpu.memory_space<vmem>>, %arg9: memref<8x128xf32, #tpu.memory_space<vmem>>, %arg10: memref<8x128xf32, #tpu.memory_space<vmem>>, %arg11: memref<8x128xf32, #tpu.memory_space<vmem>>, %arg12: memref<8x128xf32, #tpu.memory_space<vmem>>, %arg13: memref<8x128xf32, #tpu.memory_space<vmem>>, %arg14: memref<8x128xf32, #tpu.memory_space<vmem>>, %arg15: memref<8x128xf32, #tpu.memory_space<vmem>>, %arg16: memref<8x128xf32, #tpu.memory_space<vmem>>, %arg17: memref<8x128xf32, #tpu.memory_space<vmem>>, %arg18: memref<8x128xf32, #tpu.memory_space<vmem>>, %arg19: memref<8x128xf32, #tpu.memory_space<vmem>>, %arg20: memref<8x128xi32, #tpu.memory_space<vmem>>, %arg21: memref<8x128xi32, #tpu.memory_space<vmem>>) attributes {dimension_semantics = [#tpu.dimension_semantics<parallel>], iteration_bounds = array<i64: 1>, scalar_prefetch = 0 : i64, scratch_operands = 0 : i64, tpu.core_type = #tpu.core_type<tc>, window_params = [{transform_indices = @transform_0, window_bounds = array<i64: 8, 128>}, {transform_indices = @transform_1, window_bounds = array<i64: 8, 128>}, {transform_indices = @transform_2, window_bounds = array<i64: 8, 384>}, {transform_indices = @transform_3, window_bounds = array<i64: 8, 512>}, {transform_indices = @transform_4, window_bounds = array<i64: 8, 384>}, {transform_indices = @transform_5, window_bounds = array<i64: 8, 640>}, {transform_indices = @transform_6, window_bounds = array<i64: 8, 384>}, {transform_indices = @transform_7, window_bounds = array<i64: 8, 128>}, {transform_indices = @transform_8, window_bounds = array<i64: 8, 128>}, {transform_indices = @transform_9, window_bounds = array<i64: 8, 128>}, {transform_indices = @transform_10, window_bounds = array<i64: 8, 128>}, {transform_indices = @transform_11, window_bounds = array<i64: 8, 128>}, {transform_indices = @transform_12, window_bounds = array<i64: 8, 128>}, {transform_indices = @transform_13, window_bounds = array<i64: 8, 128>}, {transform_indices = @transform_14, window_bounds = array<i64: 8, 128>}, {transform_indices = @transform_15, window_bounds = array<i64: 8, 128>}, {transform_indices = @transform_16, window_bounds = array<i64: 8, 128>}, {transform_indices = @transform_17, window_bounds = array<i64: 8, 128>}, {transform_indices = @transform_18, window_bounds = array<i64: 8, 128>}, {transform_indices = @transform_19, window_bounds = array<i64: 8, 128>}, {transform_indices = @transform_20, window_bounds = array<i64: 8, 128>}]} {
    %c0 = arith.constant 0 : index
    %c0_0 = arith.constant 0 : index
    %0 = vector.load %arg1[%c0, %c0_0] : memref<8x128xf32, #tpu.memory_space<vmem>>, vector<8x128xf32>
    %c0_1 = arith.constant 0 : index
    %c0_2 = arith.constant 0 : index
    %1 = vector.load %arg2[%c0_1, %c0_2] : memref<8x128xf32, #tpu.memory_space<vmem>>, vector<8x128xf32>
    %c0_3 = arith.constant 0 : index
    %c0_4 = arith.constant 0 : index
    %2 = vector.load %arg3[%c0_3, %c0_4] : memref<8x384xf32, #tpu.memory_space<vmem>>, vector<8x128xf32>
    %c0_5 = arith.constant 0 : index
    %c128 = arith.constant 128 : index
    %3 = vector.load %arg3[%c0_5, %c128] : memref<8x384xf32, #tpu.memory_space<vmem>>, vector<8x128xf32>
    %c0_6 = arith.constant 0 : index
    %c256 = arith.constant 256 : index
    %4 = vector.load %arg3[%c0_6, %c256] : memref<8x384xf32, #tpu.memory_space<vmem>>, vector<8x128xf32>
    %5 = tpu.iota {dimensions = array<i32: 1>} : vector<8x128xi32>
    %cst = arith.constant 0.000000e+00 : f32
    %6 = vector.broadcast %cst : f32 to vector<8x128xf32>
    %cst_7 = arith.constant 0.000000e+00 : f32
    %7 = vector.broadcast %cst_7 : f32 to vector<8x128xf32>
    %cst_8 = arith.constant 1.000000e+00 : f32
    %8 = vector.broadcast %cst_8 : f32 to vector<8x128xf32>
    %cst_9 = arith.constant 0.000000e+00 : f32
    %9 = vector.broadcast %cst_9 : f32 to vector<8x128xf32>
    %10 = arith.subf %9, %8 : vector<8x128xf32>
    %c0_i32 = arith.constant 0 : i32
    %11:4 = scf.while (%arg22 = %c0_i32, %arg23 = %6, %arg24 = %7, %arg25 = %10) : (i32, vector<8x128xf32>, vector<8x128xf32>, vector<8x128xf32>) -> (i32, vector<8x128xf32>, vector<8x128xf32>, vector<8x128xf32>) {
      %cst_90 = arith.constant 0.000000e+00 : f32
      %117 = vector.broadcast %cst_90 : f32 to vector<8x128xf32>
      %118 = arith.cmpf ogt, %1, %117 : vector<8x128xf32>
      %cst_91 = arith.constant 0.000000e+00 : f32
      %119 = vector.broadcast %cst_91 : f32 to vector<8x128xf32>
      %120 = arith.cmpf oeq, %arg23, %119 : vector<8x128xf32>
      %121 = arith.andi %118, %120 : vector<8x128xi1>
      %cst_92 = arith.constant -1.000000e+30 : f32
      %122 = vector.broadcast %cst_92 : f32 to vector<8x128xf32>
      %123 = arith.select %121, %0, %122 : vector<8x128xi1>, vector<8x128xf32>
      %124 = vector.shape_cast %123 : vector<8x128xf32> to vector<1x8x128xf32>
      %cst_93 = arith.constant dense<0xFF800000> : vector<1xf32>
      %125 = vector.multi_reduction <maximumf>, %124, %cst_93 [1, 2] : vector<1x8x128xf32> to vector<1xf32>
      %126 = vector.shape_cast %125 : vector<1xf32> to vector<1x1x1xf32>
      %127 = vector.extract %126[0, 0, 0] : f32 from vector<1x1x1xf32>
      %cst_94 = arith.constant 3.000000e-01 : f32
      %128 = arith.cmpf oge, %127, %cst_94 : f32
      scf.condition(%128) %arg22, %arg23, %arg24, %arg25 : i32, vector<8x128xf32>, vector<8x128xf32>, vector<8x128xf32>
    } do {
    ^bb0(%arg22: i32, %arg23: vector<8x128xf32>, %arg24: vector<8x128xf32>, %arg25: vector<8x128xf32>):
      %cst_90 = arith.constant 0.000000e+00 : f32
      %117 = vector.broadcast %cst_90 : f32 to vector<8x128xf32>
      %118 = arith.cmpf ogt, %1, %117 : vector<8x128xf32>
      %cst_91 = arith.constant 0.000000e+00 : f32
      %119 = vector.broadcast %cst_91 : f32 to vector<8x128xf32>
      %120 = arith.cmpf oeq, %arg23, %119 : vector<8x128xf32>
      %121 = arith.andi %118, %120 : vector<8x128xi1>
      %cst_92 = arith.constant -1.000000e+30 : f32
      %122 = vector.broadcast %cst_92 : f32 to vector<8x128xf32>
      %123 = arith.select %121, %0, %122 : vector<8x128xi1>, vector<8x128xf32>
      %cst_93 = arith.constant dense<0xFF800000> : vector<8xf32>
      %124 = vector.multi_reduction <maximumf>, %123, %cst_93 [1] : vector<8x128xf32> to vector<8xf32>
      %125 = vector.shape_cast %124 : vector<8xf32> to vector<8x1xf32>
      %126 = vector.broadcast %125 : vector<8x1xf32> to vector<8x128xf32>
      %127 = arith.cmpf oeq, %123, %126 : vector<8x128xf32>
      %128 = arith.andi %121, %127 : vector<8x128xi1>
      %c128_i32 = arith.constant 128 : i32
      %129 = vector.broadcast %c128_i32 : i32 to vector<8x128xi32>
      %130 = arith.select %128, %5, %129 : vector<8x128xi1>, vector<8x128xi32>
      %cst_94 = arith.constant dense<2147483647> : vector<8xi32>
      %131 = vector.multi_reduction <minsi>, %130, %cst_94 [1] : vector<8x128xi32> to vector<8xi32>
      %132 = vector.shape_cast %131 : vector<8xi32> to vector<8x1xi32>
      %133 = vector.broadcast %132 : vector<8x1xi32> to vector<8x128xi32>
      %134 = arith.cmpi eq, %5, %133 : vector<8x128xi32>
      %135 = arith.extui %134 : vector<8x128xi1> to vector<8x128xi32>
      %136 = arith.sitofp %135 : vector<8x128xi32> to vector<8x128xf32>
      %cst_95 = arith.constant 3.000000e-01 : f32
      %137 = vector.broadcast %cst_95 : f32 to vector<8x1xf32>
      %138 = arith.cmpf oge, %125, %137 : vector<8x1xf32>
      %cst_96 = arith.constant 0.000000e+00 : f32
      %139 = vector.broadcast %cst_96 : f32 to vector<8x128xf32>
      %140 = arith.mulf %2, %136 : vector<8x128xf32>
      %cst_97 = arith.constant dense<0.000000e+00> : vector<8xf32>
      %141 = vector.multi_reduction <add>, %140, %cst_97 [1] : vector<8x128xf32> to vector<8xf32>
      %142 = vector.shape_cast %141 : vector<8xf32> to vector<8x1xf32>
      %143 = vector.broadcast %142 : vector<8x1xf32> to vector<8x128xf32>
      %144 = arith.subf %2, %143 : vector<8x128xf32>
      %145 = arith.mulf %144, %144 : vector<8x128xf32>
      %146 = arith.addf %139, %145 : vector<8x128xf32>
      %147 = arith.mulf %3, %136 : vector<8x128xf32>
      %cst_98 = arith.constant dense<0.000000e+00> : vector<8xf32>
      %148 = vector.multi_reduction <add>, %147, %cst_98 [1] : vector<8x128xf32> to vector<8xf32>
      %149 = vector.shape_cast %148 : vector<8xf32> to vector<8x1xf32>
      %150 = vector.broadcast %149 : vector<8x1xf32> to vector<8x128xf32>
      %151 = arith.subf %3, %150 : vector<8x128xf32>
      %152 = arith.mulf %151, %151 : vector<8x128xf32>
      %153 = arith.addf %146, %152 : vector<8x128xf32>
      %154 = arith.mulf %4, %136 : vector<8x128xf32>
      %cst_99 = arith.constant dense<0.000000e+00> : vector<8xf32>
      %155 = vector.multi_reduction <add>, %154, %cst_99 [1] : vector<8x128xf32> to vector<8xf32>
      %156 = vector.shape_cast %155 : vector<8xf32> to vector<8x1xf32>
      %157 = vector.broadcast %156 : vector<8x1xf32> to vector<8x128xf32>
      %158 = arith.subf %4, %157 : vector<8x128xf32>
      %159 = arith.mulf %158, %158 : vector<8x128xf32>
      %160 = arith.addf %153, %159 : vector<8x128xf32>
      %161 = vector.broadcast %138 : vector<8x1xi1> to vector<8x128xi1>
      %162 = arith.andi %134, %161 : vector<8x128xi1>
      %cst_100 = arith.constant 1.000000e+00 : f32
      %163 = vector.broadcast %cst_100 : f32 to vector<8x128xf32>
      %164 = arith.select %162, %163, %arg24 : vector<8x128xi1>, vector<8x128xf32>
      %cst_101 = arith.constant 4.900000e-01 : f32
      %165 = vector.broadcast %cst_101 : f32 to vector<8x128xf32>
      %166 = arith.cmpf ole, %160, %165 : vector<8x128xf32>
      %167 = vector.broadcast %138 : vector<8x1xi1> to vector<8x128xi1>
      %168 = arith.andi %166, %167 : vector<8x128xi1>
      %169 = arith.andi %168, %118 : vector<8x128xi1>
      %170 = arith.sitofp %arg22 : i32 to f32
      %171 = vector.broadcast %170 : f32 to vector<8x128xf32>
      %172 = arith.select %169, %171, %arg25 : vector<8x128xi1>, vector<8x128xf32>
      %cst_102 = arith.constant 1.000000e+00 : f32
      %173 = vector.broadcast %cst_102 : f32 to vector<8x128xf32>
      %174 = arith.select %169, %173, %arg23 : vector<8x128xi1>, vector<8x128xf32>
      %c1_i32_103 = arith.constant 1 : i32
      %175 = arith.addi %arg22, %c1_i32_103 : i32
      scf.yield %175, %174, %164, %172 : i32, vector<8x128xf32>, vector<8x128xf32>, vector<8x128xf32>
    }
    %c0_10 = arith.constant 0 : index
    %c0_11 = arith.constant 0 : index
    %12 = vector.load %arg8[%c0_10, %c0_11] : memref<8x128xf32, #tpu.memory_space<vmem>>, vector<8x128xf32>
    tpu.vector_store %arg8[%c0_10, %c0_11], %11#2 {strides = array<i32>} : memref<8x128xf32, #tpu.memory_space<vmem>>, vector<8x128xf32>,
    %c0_12 = arith.constant 0 : index
    %c0_13 = arith.constant 0 : index
    %13 = vector.load %arg9[%c0_12, %c0_13] : memref<8x128xf32, #tpu.memory_space<vmem>>, vector<8x128xf32>
    tpu.vector_store %arg9[%c0_12, %c0_13], %11#3 {strides = array<i32>} : memref<8x128xf32, #tpu.memory_space<vmem>>, vector<8x128xf32>,
    %c0_14 = arith.constant 0 : index
    %c0_15 = arith.constant 0 : index
    %14 = vector.load %arg4[%c0_14, %c0_15] : memref<8x512xf32, #tpu.memory_space<vmem>>, vector<8x128xf32>
    %c0_16 = arith.constant 0 : index
    %c128_17 = arith.constant 128 : index
    %15 = vector.load %arg4[%c0_16, %c128_17] : memref<8x512xf32, #tpu.memory_space<vmem>>, vector<8x128xf32>
    %c0_18 = arith.constant 0 : index
    %c256_19 = arith.constant 256 : index
    %16 = vector.load %arg4[%c0_18, %c256_19] : memref<8x512xf32, #tpu.memory_space<vmem>>, vector<8x128xf32>
    %c0_20 = arith.constant 0 : index
    %c384 = arith.constant 384 : index
    %17 = vector.load %arg4[%c0_20, %c384] : memref<8x512xf32, #tpu.memory_space<vmem>>, vector<8x128xf32>
    %cst_21 = arith.constant 5.000000e-01 : f32
    %18 = vector.broadcast %cst_21 : f32 to vector<8x128xf32>
    %19 = arith.mulf %18, %14 : vector<8x128xf32>
    %cst_22 = arith.constant 1.000000e+00 : f32
    %20 = vector.broadcast %cst_22 : f32 to vector<8x128xf32>
    %21 = arith.addf %19, %20 : vector<8x128xf32>
    %22 = math.exp %21 : vector<8x128xf32>
    %cst_23 = arith.constant 1.200000e+00 : f32
    %23 = vector.broadcast %cst_23 : f32 to vector<8x128xf32>
    %24 = arith.mulf %23, %15 : vector<8x128xf32>
    %cst_24 = arith.constant 0.000000e+00 : f32
    %25 = vector.broadcast %cst_24 : f32 to vector<8x128xf32>
    %26 = arith.addf %24, %25 : vector<8x128xf32>
    %cst_25 = arith.constant 1.000000e+00 : f32
    %27 = vector.broadcast %cst_25 : f32 to vector<8x128xf32>
    %28 = arith.mulf %27, %16 : vector<8x128xf32>
    %cst_26 = arith.constant 0.000000e+00 : f32
    %29 = vector.broadcast %cst_26 : f32 to vector<8x128xf32>
    %30 = arith.addf %28, %29 : vector<8x128xf32>
    %cst_27 = arith.constant 1.000000e+00 : f32
    %31 = vector.broadcast %cst_27 : f32 to vector<8x128xf32>
    %32 = arith.mulf %31, %17 : vector<8x128xf32>
    %cst_28 = arith.constant 0.000000e+00 : f32
    %33 = vector.broadcast %cst_28 : f32 to vector<8x128xf32>
    %34 = arith.addf %32, %33 : vector<8x128xf32>
    %c0_29 = arith.constant 0 : index
    %c0_30 = arith.constant 0 : index
    %35 = vector.load %arg11[%c0_29, %c0_30] : memref<8x128xf32, #tpu.memory_space<vmem>>, vector<8x128xf32>
    tpu.vector_store %arg11[%c0_29, %c0_30], %22 {strides = array<i32>} : memref<8x128xf32, #tpu.memory_space<vmem>>, vector<8x128xf32>,
    %c0_31 = arith.constant 0 : index
    %c0_32 = arith.constant 0 : index
    %36 = vector.load %arg10[%c0_31, %c0_32] : memref<8x128xf32, #tpu.memory_space<vmem>>, vector<8x128xf32>
    tpu.vector_store %arg10[%c0_31, %c0_32], %26 {strides = array<i32>} : memref<8x128xf32, #tpu.memory_space<vmem>>, vector<8x128xf32>,
    %c0_33 = arith.constant 0 : index
    %c0_34 = arith.constant 0 : index
    %37 = vector.load %arg12[%c0_33, %c0_34] : memref<8x128xf32, #tpu.memory_space<vmem>>, vector<8x128xf32>
    tpu.vector_store %arg12[%c0_33, %c0_34], %30 {strides = array<i32>} : memref<8x128xf32, #tpu.memory_space<vmem>>, vector<8x128xf32>,
    %c0_35 = arith.constant 0 : index
    %c0_36 = arith.constant 0 : index
    %38 = vector.load %arg13[%c0_35, %c0_36] : memref<8x128xf32, #tpu.memory_space<vmem>>, vector<8x128xf32>
    tpu.vector_store %arg13[%c0_35, %c0_36], %34 {strides = array<i32>} : memref<8x128xf32, #tpu.memory_space<vmem>>, vector<8x128xf32>,
    %39 = arith.mulf %30, %30 : vector<8x128xf32>
    %40 = arith.mulf %34, %34 : vector<8x128xf32>
    %41 = arith.addf %39, %40 : vector<8x128xf32>
    %cst_37 = arith.constant 0.000000e+00 : f32
    %42 = vector.broadcast %cst_37 : f32 to vector<8x128xf32>
    %43 = arith.cmpf ogt, %41, %42 : vector<8x128xf32>
    %cst_38 = arith.constant 1.000000e+00 : f32
    %44 = vector.broadcast %cst_38 : f32 to vector<8x128xf32>
    %45 = arith.select %43, %41, %44 : vector<8x128xi1>, vector<8x128xf32>
    %46 = math.rsqrt %45 : vector<8x128xf32>
    %47 = arith.mulf %30, %46 : vector<8x128xf32>
    %cst_39 = arith.constant 1.000000e+00 : f32
    %48 = vector.broadcast %cst_39 : f32 to vector<8x128xf32>
    %49 = arith.select %43, %47, %48 : vector<8x128xi1>, vector<8x128xf32>
    %50 = arith.mulf %22, %49 : vector<8x128xf32>
    %c0_40 = arith.constant 0 : index
    %c0_41 = arith.constant 0 : index
    %51 = vector.load %arg14[%c0_40, %c0_41] : memref<8x128xf32, #tpu.memory_space<vmem>>, vector<8x128xf32>
    tpu.vector_store %arg14[%c0_40, %c0_41], %50 {strides = array<i32>} : memref<8x128xf32, #tpu.memory_space<vmem>>, vector<8x128xf32>,
    %52 = arith.mulf %34, %46 : vector<8x128xf32>
    %cst_42 = arith.constant 0.000000e+00 : f32
    %53 = vector.broadcast %cst_42 : f32 to vector<8x128xf32>
    %54 = arith.select %43, %52, %53 : vector<8x128xi1>, vector<8x128xf32>
    %55 = arith.mulf %22, %54 : vector<8x128xf32>
    %c0_43 = arith.constant 0 : index
    %c0_44 = arith.constant 0 : index
    %56 = vector.load %arg15[%c0_43, %c0_44] : memref<8x128xf32, #tpu.memory_space<vmem>>, vector<8x128xf32>
    tpu.vector_store %arg15[%c0_43, %c0_44], %55 {strides = array<i32>} : memref<8x128xf32, #tpu.memory_space<vmem>>, vector<8x128xf32>,
    %57 = math.exp %26 : vector<8x128xf32>
    %cst_45 = arith.constant 5.000000e-01 : f32
    %58 = vector.broadcast %cst_45 : f32 to vector<8x128xf32>
    %59 = arith.mulf %22, %58 : vector<8x128xf32>
    %cst_46 = arith.constant 1.000000e+00 : f32
    %60 = vector.broadcast %cst_46 : f32 to vector<8x128xf32>
    %61 = arith.divf %60, %57 : vector<8x128xf32>
    %62 = arith.subf %57, %61 : vector<8x128xf32>
    %63 = arith.mulf %59, %62 : vector<8x128xf32>
    %c0_47 = arith.constant 0 : index
    %c0_48 = arith.constant 0 : index
    %64 = vector.load %arg16[%c0_47, %c0_48] : memref<8x128xf32, #tpu.memory_space<vmem>>, vector<8x128xf32>
    tpu.vector_store %arg16[%c0_47, %c0_48], %63 {strides = array<i32>} : memref<8x128xf32, #tpu.memory_space<vmem>>, vector<8x128xf32>,
    %c0_49 = arith.constant 0 : index
    %c0_50 = arith.constant 0 : index
    %65 = vector.load %arg5[%c0_49, %c0_50] : memref<8x384xf32, #tpu.memory_space<vmem>>, vector<8x128xf32>
    %cst_51 = arith.constant 1.000000e+01 : f32
    %66 = vector.broadcast %cst_51 : f32 to vector<8x128xf32>
    %67 = arith.mulf %65, %66 : vector<8x128xf32>
    %cst_52 = arith.constant 1.000000e-01 : f32
    %68 = vector.broadcast %cst_52 : f32 to vector<8x128xf32>
    %69 = arith.addf %67, %68 : vector<8x128xf32>
    %c0_53 = arith.constant 0 : index
    %c0_54 = arith.constant 0 : index
    %70 = vector.load %arg17[%c0_53, %c0_54] : memref<8x128xf32, #tpu.memory_space<vmem>>, vector<8x128xf32>
    tpu.vector_store %arg17[%c0_53, %c0_54], %69 {strides = array<i32>} : memref<8x128xf32, #tpu.memory_space<vmem>>, vector<8x128xf32>,
    %c0_55 = arith.constant 0 : index
    %c128_56 = arith.constant 128 : index
    %71 = vector.load %arg5[%c0_55, %c128_56] : memref<8x384xf32, #tpu.memory_space<vmem>>, vector<8x128xf32>
    %cst_57 = arith.constant 1.000000e+01 : f32
    %72 = vector.broadcast %cst_57 : f32 to vector<8x128xf32>
    %73 = arith.mulf %71, %72 : vector<8x128xf32>
    %cst_58 = arith.constant -2.000000e-01 : f32
    %74 = vector.broadcast %cst_58 : f32 to vector<8x128xf32>
    %75 = arith.addf %73, %74 : vector<8x128xf32>
    %c0_59 = arith.constant 0 : index
    %c0_60 = arith.constant 0 : index
    %76 = vector.load %arg18[%c0_59, %c0_60] : memref<8x128xf32, #tpu.memory_space<vmem>>, vector<8x128xf32>
    tpu.vector_store %arg18[%c0_59, %c0_60], %75 {strides = array<i32>} : memref<8x128xf32, #tpu.memory_space<vmem>>, vector<8x128xf32>,
    %c0_61 = arith.constant 0 : index
    %c256_62 = arith.constant 256 : index
    %77 = vector.load %arg5[%c0_61, %c256_62] : memref<8x384xf32, #tpu.memory_space<vmem>>, vector<8x128xf32>
    %cst_63 = arith.constant 2.500000e+01 : f32
    %78 = vector.broadcast %cst_63 : f32 to vector<8x128xf32>
    %79 = arith.mulf %77, %78 : vector<8x128xf32>
    %cst_64 = arith.constant 3.000000e-01 : f32
    %80 = vector.broadcast %cst_64 : f32 to vector<8x128xf32>
    %81 = arith.addf %79, %80 : vector<8x128xf32>
    %c0_65 = arith.constant 0 : index
    %c0_66 = arith.constant 0 : index
    %82 = vector.load %arg19[%c0_65, %c0_66] : memref<8x128xf32, #tpu.memory_space<vmem>>, vector<8x128xf32>
    tpu.vector_store %arg19[%c0_65, %c0_66], %81 {strides = array<i32>} : memref<8x128xf32, #tpu.memory_space<vmem>>, vector<8x128xf32>,
    %c0_67 = arith.constant 0 : index
    %c0_68 = arith.constant 0 : index
    %83 = vector.load %arg6[%c0_67, %c0_68] : memref<8x640xf32, #tpu.memory_space<vmem>>, vector<8x128xf32>
    %c0_i32_69 = arith.constant 0 : i32
    %84 = vector.broadcast %c0_i32_69 : i32 to vector<8x128xi32>
    %c0_70 = arith.constant 0 : index
    %c128_71 = arith.constant 128 : index
    %85 = vector.load %arg6[%c0_70, %c128_71] : memref<8x640xf32, #tpu.memory_space<vmem>>, vector<8x128xf32>
    %86 = arith.cmpf ogt, %85, %83 : vector<8x128xf32>
    %87 = arith.select %86, %85, %83 : vector<8x128xi1>, vector<8x128xf32>
    %c1_i32 = arith.constant 1 : i32
    %88 = vector.broadcast %c1_i32 : i32 to vector<8x128xi32>
    %89 = arith.select %86, %88, %84 : vector<8x128xi1>, vector<8x128xi32>
    %c0_72 = arith.constant 0 : index
    %c256_73 = arith.constant 256 : index
    %90 = vector.load %arg6[%c0_72, %c256_73] : memref<8x640xf32, #tpu.memory_space<vmem>>, vector<8x128xf32>
    %91 = arith.cmpf ogt, %90, %87 : vector<8x128xf32>
    %92 = arith.select %91, %90, %87 : vector<8x128xi1>, vector<8x128xf32>
    %c2_i32 = arith.constant 2 : i32
    %93 = vector.broadcast %c2_i32 : i32 to vector<8x128xi32>
    %94 = arith.select %91, %93, %89 : vector<8x128xi1>, vector<8x128xi32>
    %c0_74 = arith.constant 0 : index
    %c384_75 = arith.constant 384 : index
    %95 = vector.load %arg6[%c0_74, %c384_75] : memref<8x640xf32, #tpu.memory_space<vmem>>, vector<8x128xf32>
    %96 = arith.cmpf ogt, %95, %92 : vector<8x128xf32>
    %97 = arith.select %96, %95, %92 : vector<8x128xi1>, vector<8x128xf32>
    %c3_i32 = arith.constant 3 : i32
    %98 = vector.broadcast %c3_i32 : i32 to vector<8x128xi32>
    %99 = arith.select %96, %98, %94 : vector<8x128xi1>, vector<8x128xi32>
    %c0_76 = arith.constant 0 : index
    %c512 = arith.constant 512 : index
    %100 = vector.load %arg6[%c0_76, %c512] : memref<8x640xf32, #tpu.memory_space<vmem>>, vector<8x128xf32>
    %101 = arith.cmpf ogt, %100, %97 : vector<8x128xf32>
    %c4_i32 = arith.constant 4 : i32
    %102 = vector.broadcast %c4_i32 : i32 to vector<8x128xi32>
    %103 = arith.select %101, %102, %99 : vector<8x128xi1>, vector<8x128xi32>
    %c0_77 = arith.constant 0 : index
    %c0_78 = arith.constant 0 : index
    %104 = vector.load %arg20[%c0_77, %c0_78] : memref<8x128xi32, #tpu.memory_space<vmem>>, vector<8x128xi32>
    tpu.vector_store %arg20[%c0_77, %c0_78], %103 {strides = array<i32>} : memref<8x128xi32, #tpu.memory_space<vmem>>, vector<8x128xi32>,
    %c0_79 = arith.constant 0 : index
    %c0_80 = arith.constant 0 : index
    %105 = vector.load %arg7[%c0_79, %c0_80] : memref<8x384xf32, #tpu.memory_space<vmem>>, vector<8x128xf32>
    %c0_i32_81 = arith.constant 0 : i32
    %106 = vector.broadcast %c0_i32_81 : i32 to vector<8x128xi32>
    %c0_82 = arith.constant 0 : index
    %c128_83 = arith.constant 128 : index
    %107 = vector.load %arg7[%c0_82, %c128_83] : memref<8x384xf32, #tpu.memory_space<vmem>>, vector<8x128xf32>
    %108 = arith.cmpf ogt, %107, %105 : vector<8x128xf32>
    %109 = arith.select %108, %107, %105 : vector<8x128xi1>, vector<8x128xf32>
    %c1_i32_84 = arith.constant 1 : i32
    %110 = vector.broadcast %c1_i32_84 : i32 to vector<8x128xi32>
    %111 = arith.select %108, %110, %106 : vector<8x128xi1>, vector<8x128xi32>
    %c0_85 = arith.constant 0 : index
    %c256_86 = arith.constant 256 : index
    %112 = vector.load %arg7[%c0_85, %c256_86] : memref<8x384xf32, #tpu.memory_space<vmem>>, vector<8x128xf32>
    %113 = arith.cmpf ogt, %112, %109 : vector<8x128xf32>
    %c2_i32_87 = arith.constant 2 : i32
    %114 = vector.broadcast %c2_i32_87 : i32 to vector<8x128xi32>
    %115 = arith.select %113, %114, %111 : vector<8x128xi1>, vector<8x128xi32>
    %c0_88 = arith.constant 0 : index
    %c0_89 = arith.constant 0 : index
    %116 = vector.load %arg21[%c0_88, %c0_89] : memref<8x128xi32, #tpu.memory_space<vmem>>, vector<8x128xi32>
    tpu.vector_store %arg21[%c0_88, %c0_89], %115 {strides = array<i32>} : memref<8x128xi32, #tpu.memory_space<vmem>>, vector<8x128xi32>,
    return
  }
  func.func @transform_0(%arg0: i32) -> (i32, i32) {
    %c0_i32 = arith.constant 0 : i32
    %c0_i32_0 = arith.constant 0 : i32
    return %arg0, %c0_i32 : i32, i32
  }
  func.func @transform_1(%arg0: i32) -> (i32, i32) {
    %c0_i32 = arith.constant 0 : i32
    %c0_i32_0 = arith.constant 0 : i32
    return %arg0, %c0_i32 : i32, i32
  }
  func.func @transform_2(%arg0: i32) -> (i32, i32) {
    %c0_i32 = arith.constant 0 : i32
    %c0_i32_0 = arith.constant 0 : i32
    return %arg0, %c0_i32 : i32, i32
  }
  func.func @transform_3(%arg0: i32) -> (i32, i32) {
    %c0_i32 = arith.constant 0 : i32
    %c0_i32_0 = arith.constant 0 : i32
    return %arg0, %c0_i32 : i32, i32
  }
  func.func @transform_4(%arg0: i32) -> (i32, i32) {
    %c0_i32 = arith.constant 0 : i32
    %c0_i32_0 = arith.constant 0 : i32
    return %arg0, %c0_i32 : i32, i32
  }
  func.func @transform_5(%arg0: i32) -> (i32, i32) {
    %c0_i32 = arith.constant 0 : i32
    %c0_i32_0 = arith.constant 0 : i32
    return %arg0, %c0_i32 : i32, i32
  }
  func.func @transform_6(%arg0: i32) -> (i32, i32) {
    %c0_i32 = arith.constant 0 : i32
    %c0_i32_0 = arith.constant 0 : i32
    return %arg0, %c0_i32 : i32, i32
  }
  func.func @transform_7(%arg0: i32) -> (i32, i32) {
    %c0_i32 = arith.constant 0 : i32
    %c0_i32_0 = arith.constant 0 : i32
    return %arg0, %c0_i32 : i32, i32
  }
  func.func @transform_8(%arg0: i32) -> (i32, i32) {
    %c0_i32 = arith.constant 0 : i32
    %c0_i32_0 = arith.constant 0 : i32
    return %arg0, %c0_i32 : i32, i32
  }
  func.func @transform_9(%arg0: i32) -> (i32, i32) {
    %c0_i32 = arith.constant 0 : i32
    %c0_i32_0 = arith.constant 0 : i32
    return %arg0, %c0_i32 : i32, i32
  }
  func.func @transform_10(%arg0: i32) -> (i32, i32) {
    %c0_i32 = arith.constant 0 : i32
    %c0_i32_0 = arith.constant 0 : i32
    return %arg0, %c0_i32 : i32, i32
  }
  func.func @transform_11(%arg0: i32) -> (i32, i32) {
    %c0_i32 = arith.constant 0 : i32
    %c0_i32_0 = arith.constant 0 : i32
    return %arg0, %c0_i32 : i32, i32
  }
  func.func @transform_12(%arg0: i32) -> (i32, i32) {
    %c0_i32 = arith.constant 0 : i32
    %c0_i32_0 = arith.constant 0 : i32
    return %arg0, %c0_i32 : i32, i32
  }
  func.func @transform_13(%arg0: i32) -> (i32, i32) {
    %c0_i32 = arith.constant 0 : i32
    %c0_i32_0 = arith.constant 0 : i32
    return %arg0, %c0_i32 : i32, i32
  }
  func.func @transform_14(%arg0: i32) -> (i32, i32) {
    %c0_i32 = arith.constant 0 : i32
    %c0_i32_0 = arith.constant 0 : i32
    return %arg0, %c0_i32 : i32, i32
  }
  func.func @transform_15(%arg0: i32) -> (i32, i32) {
    %c0_i32 = arith.constant 0 : i32
    %c0_i32_0 = arith.constant 0 : i32
    return %arg0, %c0_i32 : i32, i32
  }
  func.func @transform_16(%arg0: i32) -> (i32, i32) {
    %c0_i32 = arith.constant 0 : i32
    %c0_i32_0 = arith.constant 0 : i32
    return %arg0, %c0_i32 : i32, i32
  }
  func.func @transform_17(%arg0: i32) -> (i32, i32) {
    %c0_i32 = arith.constant 0 : i32
    %c0_i32_0 = arith.constant 0 : i32
    return %arg0, %c0_i32 : i32, i32
  }
  func.func @transform_18(%arg0: i32) -> (i32, i32) {
    %c0_i32 = arith.constant 0 : i32
    %c0_i32_0 = arith.constant 0 : i32
    return %arg0, %c0_i32 : i32, i32
  }
  func.func @transform_19(%arg0: i32) -> (i32, i32) {
    %c0_i32 = arith.constant 0 : i32
    %c0_i32_0 = arith.constant 0 : i32
    return %arg0, %c0_i32 : i32, i32
  }
  func.func @transform_20(%arg0: i32) -> (i32, i32) {
    %c0_i32 = arith.constant 0 : i32
    %c0_i32_0 = arith.constant 0 : i32
    return %arg0, %c0_i32 : i32, i32
  }
}

</mosaic_0001>

<bundles_post_ra>
// kernel: tpu_custom_call.1
= control target key start
LH: loop header
LB: loop body
LE: loop exit
PB: predicated region body
PF: predicated region fallthrough
CT: control target
= control target key end

     0   :  { %s1645_s0 = inlined_call_operand.hbm [shape: f32[8,128], index: 0, kind: input, shape index: {}]   ;;  %s1646_s1 = inlined_call_operand.hbm [shape: f32[8,128], index: 1, kind: input, shape index: {}]   ;;  %s1647_s2 = inlined_call_operand.hbm [shape: f32[8,384], index: 2, kind: input, shape index: {}]   ;;  %s1648_s3 = inlined_call_operand.hbm [shape: f32[8,512], index: 3, kind: input, shape index: {}]   ;;  %s1649_s4 = inlined_call_operand.hbm [shape: f32[8,384], index: 4, kind: input, shape index: {}]   ;;  %s1650_s5 = inlined_call_operand.hbm [shape: f32[8,640], index: 5, kind: input, shape index: {}]   ;;  %s1651_s6 = inlined_call_operand.hbm [shape: f32[8,384], index: 6, kind: input, shape index: {}]   ;;  %s1652_s7 = inlined_call_operand.hbm [shape: f32[8,128], index: 7, kind: output, shape index: {0}]   ;;  %s1653_s8 = inlined_call_operand.hbm [shape: f32[8,128], index: 8, kind: output, shape index: {1}]   ;;  %s1654_s9 = inlined_call_operand.hbm [shape: f32[8,128], index: 9, kind: output, shape index: {2}]   ;;  %s1655_s10 = inlined_call_operand.hbm [shape: f32[8,128], index: 10, kind: output, shape index: {3}]   ;;  %s1656_s11 = inlined_call_operand.hbm [shape: f32[8,128], index: 11, kind: output, shape index: {4}]   ;;  %s1657_s12 = inlined_call_operand.hbm [shape: f32[8,128], index: 12, kind: output, shape index: {5}]   ;;  %s1658_s13 = inlined_call_operand.hbm [shape: f32[8,128], index: 13, kind: output, shape index: {6}]   ;;  %s1659_s14 = inlined_call_operand.hbm [shape: f32[8,128], index: 14, kind: output, shape index: {7}]   ;;  %s1660_s15 = inlined_call_operand.hbm [shape: f32[8,128], index: 15, kind: output, shape index: {8}]   ;;  %s1661_s16 = inlined_call_operand.hbm [shape: f32[8,128], index: 16, kind: output, shape index: {9}]   ;;  %s1662_s17 = inlined_call_operand.hbm [shape: f32[8,128], index: 17, kind: output, shape index: {10}]   ;;  %s1663_s18 = inlined_call_operand.hbm [shape: f32[8,128], index: 18, kind: output, shape index: {11}]   ;;  %s1664_s19 = inlined_call_operand.hbm [shape: s32[8,128], index: 19, kind: output, shape index: {12}]   ;;  %s1665_s20 = inlined_call_operand.hbm [shape: s32[8,128], index: 20, kind: output, shape index: {13}]  }
   0x1   :  { %1671 = sst [smem:[#allocation47_spill]] %s1645_s0 }
   0x2   :  { %1672 = sst [smem:[#allocation48_spill]] %s1646_s1 }
   0x3   :  { %1673 = sst [smem:[#allocation49_spill]] %s1647_s2 }
   0x4   :  { %1674 = sst [smem:[#allocation50_spill]] %s1648_s3 }
   0x5   :  { %1675 = sst [smem:[#allocation51_spill]] %s1649_s4 }
   0x6   :  { %26 = vsyncpa [#allocation3], 0 }
   0x7   :  { %27 = vsyncpa [#allocation6], 0 }
   0x8   :  { %28 = vsyncpa [#allocation9], 0 }
   0x9   :  { %29 = vsyncpa [#allocation12], 0 }
   0xa   :  { %30 = vsyncpa [#allocation4], 0 }
   0xb   :  { %31 = vsyncpa [#allocation16], 0 }
   0xc   :  { %32 = vsyncpa [#allocation19], 0 }
   0xd   :  { %33 = vsyncpa [#allocation22], 0 }
   0xe   :  { %34 = vsyncpa [#allocation25], 0 }
   0xf   :  { %35 = vsyncpa [#allocation28], 0 }
  0x10   :  { %36 = vsyncpa [#allocation31], 0 }
  0x11   :  { %37 = vsyncpa [#allocation34], 0  ;;  %s1133_s1 = smov [#allocation5]   ;;  %s1134_s23 = smov [#allocation8]  }
  0x12   :  { %s54_s22 = sshll.u32 %s1133_s1, 4  ;;  %s74_s24 = sshll.u32 %s1134_s23, 4  ;;  %s55_s22 = int_to_ptr.vmem [resolvable:$true] %s54_s22  ;;  %s75_s24 = int_to_ptr.vmem [resolvable:$true] %s74_s24 }
  0x13   :  { %s1676_s3 = sld [smem:[#allocation48_spill]] }
  0x19   :  { %s599_s26 = scalar_lea.hbm %s1676_s3, 128 }
  0x1a   :  { %p600_p0 = scmp.ne.s32.totalorder %s1676_s3, %s599_s26  ;;  %p603_p1 = scmp.lt.u32.totalorder %s599_s26, %s1676_s3 }
  0x1c   :  { %p605_p2 = pnand %p603_p1, %p600_p0 }
  0x1e   :  { %608 = shalt.err (!%p605_p2)
}
  0x1f   :  { %s609_s30 = scalar_lea.vmem %s55_s22, 128  ;;  %p614_p4 = scmp.lt.s32.totalorder %s55_s22, %s55_s22 }
  0x20   :  { %p610_p3 = scmp.ne.s32.totalorder %s55_s22, %s609_s30  ;;  %p615_p5 = scmp.lt.s32.totalorder %s609_s30, %s609_s30 }
  0x22   :  { %p616_p6 = por %p615_p5, %p614_p4 }
  0x24   :  { %p617_p7 = pnand %p616_p6, %p610_p3 }
  0x26   :  { %620 = shalt.err (!%p617_p7)
}
  0x27   :  { %57 = dma.hbm_to_vmem [thread:$0]  %s1676_s3, 128, %s55_s22, [#allocation6]  }
  0x28   :  { %s1677_s2 = sld [smem:[#allocation50_spill]] }
  0x2e   :  { %s621_s25 = scalar_lea.hbm %s1677_s2, 512 }
  0x2f   :  { %p622_p8 = scmp.ne.s32.totalorder %s1677_s2, %s621_s25  ;;  %p625_p9 = scmp.lt.u32.totalorder %s621_s25, %s1677_s2 }
  0x31   :  { %p627_p10 = pnand %p625_p9, %p622_p8 }
  0x33   :  { %630 = shalt.err (!%p627_p10)
}
  0x34   :  { %s631_s29 = scalar_lea.vmem %s75_s24, 512  ;;  %p636_p12 = scmp.lt.s32.totalorder %s75_s24, %s75_s24 }
  0x35   :  { %p632_p11 = scmp.ne.s32.totalorder %s75_s24, %s631_s29  ;;  %p637_p13 = scmp.lt.s32.totalorder %s631_s29, %s631_s29 }
  0x37   :  { %p638_p0 = por %p637_p13, %p636_p12 }
  0x39   :  { %p639_p1 = pnand %p638_p0, %p632_p11 }
  0x3b   :  { %642 = shalt.err (!%p639_p1)
}
  0x3c   :  { %77 = dma.hbm_to_vmem [thread:$0]  %s1677_s2, 512, %s75_s24, [#allocation9]  }
  0x3d   :  { %s1135_s30 = smov [#allocation11]   ;;  %s1136_s21 = smov [#allocation2]  }
  0x3e   :  { %s94_s0 = sshll.u32 %s1135_s30, 4  ;;  %s44_s1 = sshll.u32 %s1136_s21, 4  ;;  %s95_s0 = int_to_ptr.vmem [resolvable:$true] %s94_s0  ;;  %s45_s1 = int_to_ptr.vmem [resolvable:$true] %s44_s1 }
  0x3f   :  { %s643_s27 = scalar_lea.hbm %s1650_s5, 640 }
  0x40   :  { %p644_p2 = scmp.ne.s32.totalorder %s1650_s5, %s643_s27  ;;  %p647_p3 = scmp.lt.u32.totalorder %s643_s27, %s1650_s5 }
  0x42   :  { %p649_p4 = pnand %p647_p3, %p644_p2 }
  0x44   :  { %652 = shalt.err (!%p649_p4)
}
  0x45   :  { %s653_s24 = scalar_lea.vmem %s95_s0, 640  ;;  %p658_p6 = scmp.lt.s32.totalorder %s95_s0, %s95_s0 }
  0x46   :  { %p654_p5 = scmp.ne.s32.totalorder %s95_s0, %s653_s24  ;;  %p659_p7 = scmp.lt.s32.totalorder %s653_s24, %s653_s24 }
  0x48   :  { %p660_p8 = por %p659_p7, %p658_p6 }
  0x4a   :  { %p661_p9 = pnand %p660_p8, %p654_p5 }
  0x4c   :  { %664 = shalt.err (!%p661_p9)
}
  0x4d   :  { %97 = dma.hbm_to_vmem [thread:$0]  %s1650_s5, 640, %s95_s0, [#allocation12]  }
  0x4e   :  { %s1678_s21 = sld [smem:[#allocation47_spill]] }
  0x54   :  { %s665_s23 = scalar_lea.hbm %s1678_s21, 128 }
  0x55   :  { %p666_p10 = scmp.ne.s32.totalorder %s1678_s21, %s665_s23  ;;  %p669_p11 = scmp.lt.u32.totalorder %s665_s23, %s1678_s21 }
  0x57   :  { %p671_p12 = pnand %p669_p11, %p666_p10 }
  0x59   :  { %674 = shalt.err (!%p671_p12)
}
  0x5a   :  { %s675_s4 = scalar_lea.vmem %s45_s1, 128  ;;  %p680_p0 = scmp.lt.s32.totalorder %s45_s1, %s45_s1 }
  0x5b   :  { %p676_p13 = scmp.ne.s32.totalorder %s45_s1, %s675_s4  ;;  %p681_p1 = scmp.lt.s32.totalorder %s675_s4, %s675_s4 }
  0x5d   :  { %p682_p2 = por %p681_p1, %p680_p0 }
  0x5f   :  { %p683_p3 = pnand %p682_p2, %p676_p13 }
  0x61   :  { %686 = shalt.err (!%p683_p3)
}
  0x62   :  { %47 = dma.hbm_to_vmem [thread:$0]  %s1678_s21, 128, %s45_s1, [#allocation3]  }
  0x63   :  { %s1137_s29 = smov [#allocation7]   ;;  %s1138_s2 = smov [#allocation10]  }
  0x64   :  { %s64_s24 = sshll.u32 %s1137_s29, 4  ;;  %s84_s22 = sshll.u32 %s1138_s2, 4  ;;  %s65_s24 = int_to_ptr.vmem [resolvable:$true] %s64_s24  ;;  %s85_s22 = int_to_ptr.vmem [resolvable:$true] %s84_s22 }
  0x65   :  { %s1679_s23 = sld [smem:[#allocation49_spill]] }
  0x6b   :  { %s687_s25 = scalar_lea.hbm %s1679_s23, 384 }
  0x6c   :  { %p688_p4 = scmp.ne.s32.totalorder %s1679_s23, %s687_s25  ;;  %p691_p5 = scmp.lt.u32.totalorder %s687_s25, %s1679_s23 }
  0x6e   :  { %p693_p6 = pnand %p691_p5, %p688_p4 }
  0x70   :  { %696 = shalt.err (!%p693_p6)
}
  0x71   :  { %s697_s1 = scalar_lea.vmem %s65_s24, 384  ;;  %p702_p8 = scmp.lt.s32.totalorder %s65_s24, %s65_s24 }
  0x72   :  { %p698_p7 = scmp.ne.s32.totalorder %s65_s24, %s697_s1  ;;  %p703_p9 = scmp.lt.s32.totalorder %s697_s1, %s697_s1 }
  0x74   :  { %p704_p10 = por %p703_p9, %p702_p8 }
  0x76   :  { %p705_p11 = pnand %p704_p10, %p698_p7 }
  0x78   :  { %708 = shalt.err (!%p705_p11)
}
  0x79   :  { %67 = dma.hbm_to_vmem [thread:$0]  %s1679_s23, 384, %s65_s24, [#allocation6]  }
  0x7a   :  { %s1680_s2 = sld [smem:[#allocation51_spill]] }
  0x80   :  { %s709_s3 = scalar_lea.hbm %s1680_s2, 384 }
  0x81   :  { %p710_p12 = scmp.ne.s32.totalorder %s1680_s2, %s709_s3  ;;  %p713_p13 = scmp.lt.u32.totalorder %s709_s3, %s1680_s2 }
  0x83   :  { %p715_p0 = pnand %p713_p13, %p710_p12 }
  0x85   :  { %718 = shalt.err (!%p715_p0)
}
  0x86   :  { %s719_s26 = scalar_lea.vmem %s85_s22, 384  ;;  %p724_p2 = scmp.lt.s32.totalorder %s85_s22, %s85_s22 }
  0x87   :  { %p720_p1 = scmp.ne.s32.totalorder %s85_s22, %s719_s26  ;;  %p725_p3 = scmp.lt.s32.totalorder %s719_s26, %s719_s26 }
  0x89   :  { %p726_p4 = por %p725_p3, %p724_p2 }
  0x8b   :  { %p727_p5 = pnand %p726_p4, %p720_p1 }
  0x8d   :  { %730 = shalt.err (!%p727_p5)
}
  0x8e   :  { %87 = dma.hbm_to_vmem [thread:$0]  %s1680_s2, 384, %s85_s22, [#allocation9]  }
  0x8f   :  { %s1139_s4 = smov [#allocation13]   ;;  %s731_s0 = scalar_lea.hbm %s1651_s6, 384 }
  0x90   :  { %s104_s1 = sshll.u32 %s1139_s4, 4  ;;  %p732_p6 = scmp.ne.s32.totalorder %s1651_s6, %s731_s0  ;;  %s105_s1 = int_to_ptr.vmem [resolvable:$true] %s104_s1 }
  0x91   :  { %p735_p7 = scmp.lt.u32.totalorder %s731_s0, %s1651_s6 }
  0x93   :  { %p737_p8 = pnand %p735_p7, %p732_p6 }
  0x95   :  { %740 = shalt.err (!%p737_p8)
}
  0x96   :  { %s741_s25 = scalar_lea.vmem %s105_s1, 384  ;;  %p746_p10 = scmp.lt.s32.totalorder %s105_s1, %s105_s1 }
  0x97   :  { %p742_p9 = scmp.ne.s32.totalorder %s105_s1, %s741_s25  ;;  %p747_p11 = scmp.lt.s32.totalorder %s741_s25, %s741_s25 }
  0x99   :  { %p748_p12 = por %p747_p11, %p746_p10 }
  0x9b   :  { %p749_p13 = pnand %p748_p12, %p742_p9 }
  0x9d   :  { %752 = shalt.err (!%p749_p13)
}
  0x9e   :  { %107 = dma.hbm_to_vmem [thread:$0]  %s1651_s6, 384, %s105_s1, [#allocation12]  }
  0x9f   :  { %1085 = dma.done.wait [#allocation3], 128  }
  0xa0   :  { %1086 = vsyncadd [#allocation3], 4294967168 }
  0xa1   :  { %1087 = dma.done.wait [#allocation6], 512  }
  0xa2   :  { %1088 = vsyncadd [#allocation6], 4294966784 }
  0xa3   :  { %1089 = dma.done.wait [#allocation9], 896  }
  0xa4   :  { %1090 = vsyncadd [#allocation9], 4294966400 }
  0xa5   :  { %1091 = dma.done.wait [#allocation12], 1024  }
  0xa6   :  { %1092 = vsyncadd [#allocation12], 4294966272  ;;  %v134_v0 = vlaneseq  ;;  %v1347_v2 = vld [vmem:[#allocation2] sm:$0xff]  ;;  %v1349_v3 = vld [vmem:[#allocation5] sm:$0xff]  ;;  %v1361_v15 = vmov -1.0   ;;  %v1363_v16 = vmov 0.0  }
  0xa7   :  { %v1351_v4 = vld [vmem:[#allocation7] sm:$0xff]  ;;  %v1353_v5 = vld [vmem:[#allocation7 + $0x8] sm:$0xff]  ;;  %v1355_v6 = vld [vmem:[#allocation7 + $0x10] sm:$0xff]  ;;  %vm491_vm0 = vcmp.gt.f32.partialorder %v1349_v3, 0.0 }
  0xa8   :  { %v1345_v1 = vand.u32 127, %v134_v0  ;;  %v494_v7 = vsel %vm491_vm0, %v1347_v2, -1e+30 }
  0xa9   :  { %495 = vmax.xlane.f32.xlu0 %v494_v7 }
 0x136   :  { %v496_v8 = vpop.xlane.xlu0 %495 }
 0x137   :  { %v497_v9 = vrot.slane %v496_v8, 4 }
 0x139   :  { %v498_v10 = vmax.f32 %v496_v8, %v497_v9 }
 0x13b   :  { %v499_v11 = vrot.slane %v498_v10, 2 }
 0x13d   :  { %v500_v12 = vmax.f32 %v498_v10, %v499_v11 }
 0x13f   :  { %v501_v13 = vrot.slane %v500_v12, 1 }
 0x141   :  { %v502_v14 = vmax.f32 %v500_v12, %v501_v13 }
 0x143   :  { %516 = vpush %v502_v14 }
 0x174   :  { %s517_s6 = spop %516 }
 0x175   :  { %p504_p0 = scmp.ge.f32.partialorder %s517_s6, 0.3 }
 0x176   :  { %v1365_v17 = vmov (%p504_p0), -1.0   ;;  %v1367_v18 = vmov (%p504_p0), 0.0   ;;  %v1369_v19 = vmov (%p504_p0), 0.0   ;;  %s1371_s27 = smov (%p504_p0), 0  }
 0x177   :  { %506 = sbr.rel (!%p504_p0) target bundleno = 1200 (0x4b0), region = 181 }
 0x17e LB: > { %vm159_vm1 = vcmp.eq.f32.partialorder %v1119_v19, 0.0  ;;  %v1140_v34 = vmov 0.0   ;;  %s214_s26 = sadd.s32 1, %s1123_s27   ;;  %s210_s24 = scvt.s32.f32 %s1123_s27  ;;  %s1123_s27 = sphi %s1371_s27, %s1683_s27   ;;  %v1119_v19 = vphi %v1369_v19, %v213_v19   ;;  %v1115_v18 = vphi %v1367_v18, %v1682_v18   ;;  %v1111_v17 = vphi %v1365_v17, %v1681_v17  }
 0x17f   : > { %vm160_vm2 = vmand %vm491_vm0, %vm159_vm1  ;;  %s1683_s27 = smov %s214_s26 }
 0x180   : > { %v161_v20 = vsel %vm160_vm2, %v1347_v2, -1e+30  ;;  %v211_v51 = vstv %s210_s24 }
 0x181   : > { %162 = vmax.xlane.f32.xlu0 %v161_v20 }
 0x20e   : > { %v163_v21 = vpop.xlane.xlu0 %162 }
 0x20f   : > { %vm164_vm3 = vcmp.eq.f32.partialorder %v161_v20, %v163_v21  ;;  %vm184_vm6 = vcmp.ge.f32.partialorder %v163_v21, 0.3 }
 0x210   : > { %vm165_vm4 = vmand %vm160_vm2, %vm164_vm3 }
 0x211   : > { %v166_v22 = vsel %vm165_vm4, %v1345_v1, 128 }
 0x212   : > { %v168_v23 = vshra.s32 %v166_v22, 16  ;;  %v167_v25 = vand.u32 65535, %v166_v22 }
 0x214   : > { %v170_v24 = vcvt.s32.f32 %v168_v23  ;;  %v169_v27 = vcvt.s32.f32 %v167_v25 }
 0x216   : > { %171 = vmin.xlane.f32.xlu0 %v170_v24 }
 0x2a3   : > { %v172_v26 = vpop.xlane.xlu0 %171 }
 0x2a4   : > { %vm173_vm5 = vcmp.eq.f32.partialorder %v170_v24, %v172_v26  ;;  %v178_v29 = vcvt.f32.s32 %v172_v26 }
 0x2a5   : > { %v174_v28 = vsel %vm173_vm5, %v169_v27, inf }
 0x2a6   : > { %175 = vmin.xlane.f32.xlu1 %v174_v28  ;;  %v179_v31 = vshll.u32 %v178_v29, 16 }
 0x333   : > { %v176_v30 = vpop.xlane.xlu1 %175 }
 0x334   : > { %v177_v32 = vcvt.f32.s32 %v176_v30 }
 0x336   : > { %v180_v33 = vadd.s32 %v179_v31, %v177_v32 }
 0x338   : > { %vm181_vm7 = vcmp.eq.s32.totalorder %v1345_v1, %v180_v33 }
 0x339   : > { %vm205_vm8 = vmand %vm181_vm7, %vm184_vm6  ;;  %v515_v35 = vsel %vm181_vm7, 1.0, %v1140_v34 }
 0x33a   : > { %v206_v36 = vsel %vm205_vm8, 1.0, %v1115_v18   ;;  %v191_v37 = vmul.f32 %v515_v35, %v1353_v5  ;;  %v185_v38 = vmul.f32 %v515_v35, %v1351_v4  ;;  %v197_v39 = vmul.f32 %v515_v35, %v1355_v6 }
 0x33b   : > { %v1682_v18 = vmov %v206_v36 }
 0x33c   : > { %192 = vadd.xlane.f32.xlu0 %v191_v37  ;;  %186 = vadd.xlane.f32.xlu1 %v185_v38 }
 0x340   : > { %198 = vadd.xlane.f32.xlu1 %v197_v39 }
 0x3c9   : > { %v193_v40 = vpop.xlane.xlu0 %192  ;;  %v187_v41 = vpop.xlane.xlu1 %186 }
 0x3ca   : > { %v194_v42 = vsub.f32 %v1353_v5, %v193_v40  ;;  %v188_v43 = vsub.f32 %v1351_v4, %v187_v41 }
 0x3cc   : > { %v195_v44 = vmul.f32 %v194_v42, %v194_v42  ;;  %v189_v45 = vmul.f32 %v188_v43, %v188_v43 }
 0x3cd   : > { %v199_v46 = vpop.xlane.xlu1 %198 }
 0x3ce   : > { %v200_v47 = vsub.f32 %v1355_v6, %v199_v46  ;;  %v196_v48 = vadd.f32 %v195_v44, %v189_v45 }
 0x3d0   : > { %v201_v49 = vmul.f32 %v200_v47, %v200_v47 }
 0x3d2   : > { %v202_v50 = vadd.f32 %v201_v49, %v196_v48 }
 0x3d4   : > { %vm207_vm9 = vcmp.le.f32.partialorder %v202_v50, 0.49 }
 0x3d5   : > { %vm208_vm10 = vmand %vm207_vm9, %vm184_vm6 }
 0x3d6   : > { %vm209_vm11 = vmand %vm208_vm10, %vm491_vm0 }
 0x3d7   : > { %v212_v52 = vsel %vm209_vm11, %v211_v51, %v1111_v17   ;;  %v213_v19 = vsel %vm209_vm11, 1.0, %v1119_v19  }
 0x3d8   : > { %vm142_vm12 = vcmp.eq.f32.partialorder %v213_v19, 0.0  ;;  %v1681_v17 = vmov %v212_v52 }
 0x3d9   : > { %vm143_vm13 = vmand %vm491_vm0, %vm142_vm12 }
 0x3da   : > { %v144_v53 = vsel %vm143_vm13, %v1347_v2, -1e+30 }
 0x3db   : > { %145 = vmax.xlane.f32.xlu0 %v144_v53 }
 0x468   : > { %v146_v54 = vpop.xlane.xlu0 %145 }
 0x469   : > { %v147_v55 = vrot.slane %v146_v54, 4 }
 0x46b   : > { %v148_v56 = vmax.f32 %v146_v54, %v147_v55 }
 0x46d   : > { %v149_v57 = vrot.slane %v148_v56, 2 }
 0x46f   : > { %v150_v58 = vmax.f32 %v148_v56, %v149_v57 }
 0x471   : > { %v151_v59 = vrot.slane %v150_v58, 1 }
 0x473   : > { %v152_v60 = vmax.f32 %v150_v58, %v151_v59 }
 0x475   : > { %518 = vpush %v152_v60 }
 0x4a6   : > { %s519_s23 = spop %518 }
 0x4a7   : > { %p154_p1 = scmp.ge.f32.partialorder %s519_s23, 0.3 }
 0x4a8   :  { %v1684_v15 = vmov (!%p154_p1), %v212_v52  ;;  %v1685_v16 = vmov (!%p154_p1), %v206_v36 }
 0x4a9   :  { %157 = sbr.rel (%p154_p1) target bundleno = 382 (0x17e), region = 187 }
 0x4b0 PF:  { %216 = vst [vmem:[#allocation15] sm:$0xff] %v1127_v15  ;;  %v217_v61 = vld [vmem:[#allocation8] sm:$0xff]  ;;  %v1415_v62 = vld [vmem:[#allocation8 + $0x18] sm:$0xff]  ;;  %v1417_v63 = vld [vmem:[#allocation8 + $0x10] sm:$0xff]  ;;  %s1141_s4 = smov [#allocation15]   ;;  %s1142_s21 = smov [#allocation18]   ;;  %v1131_v16 = vphi %v1363_v16, %v1685_v16   ;;  %v1127_v15 = vphi %v1361_v15, %v1684_v15  }
 0x4b1   :  { %215 = vst [vmem:[#allocation14] sm:$0xff] %v1131_v16  ;;  %v221_v0 = vmul.f32 0.5, %v217_v61  ;;  %232 = vst [vmem:[#allocation21] sm:$0xff] %v1415_v62  ;;  %v234_v1 = vmul.f32 %v1415_v62, %v1415_v62  ;;  %v233_v2 = vmul.f32 %v1417_v63, %v1417_v63  ;;  %v255_v3 = vld [vmem:[#allocation10] sm:$0xff]  ;;  %v263_v4 = vld [vmem:[#allocation10 + $0x10] sm:$0xff]  ;;  %s309_s1 = sshll.u32 %s1141_s4, 4  ;;  %s1427_s1 = int_to_ptr.vmem [resolvable:$true] %s309_s1 }
 0x4b2   :  { %231 = vst [vmem:[#allocation20] sm:$0xff] %v1417_v63  ;;  %v218_v5 = vld [vmem:[#allocation8 + $0x8] sm:$0xff]  ;;  %v256_v6 = vmul.f32 10.0, %v255_v3  ;;  %v264_v7 = vmul.f32 25.0, %v263_v4  ;;  %v267_v10 = vld [vmem:[#allocation11] sm:$0xff]  ;;  %v268_v14 = vld [vmem:[#allocation11 + $0x8] sm:$0xff]  ;;  %p758_p3 = scmp.lt.s32.totalorder %s1427_s1, %s1427_s1 }
 0x4b3   :  { %v225_v8 = vmul.f32 1.2, %v218_v5  ;;  %v259_v9 = vld [vmem:[#allocation10 + $0x8] sm:$0xff]  ;;  %v222_v11 = vadd.f32 1.0, %v221_v0  ;;  %v1425_v12 = vadd.f32 %v234_v1, %v233_v2  ;;  %s329_s5 = sshll.u32 %s1142_s21, 4  ;;  %vm269_vm14 = vcmp.gt.f32.partialorder %v268_v14, %v267_v10  ;;  %v276_v22 = vld [vmem:[#allocation11 + $0x18] sm:$0xff]  ;;  %s1433_s5 = int_to_ptr.vmem [resolvable:$true] %s329_s5 }
 0x4b4   :  { %v260_v13 = vmul.f32 10.0, %v259_v9  ;;  %v272_v15 = vld [vmem:[#allocation11 + $0x10] sm:$0xff]  ;;  %v257_v16 = vadd.f32 0.1, %v256_v6  ;;  %v265_v17 = vadd.f32 0.3, %v264_v7  ;;  %v270_v21 = vsel %vm269_vm14, %v268_v14, %v267_v10 }
 0x4b5   :  { %230 = vst [vmem:[#allocation17] sm:$0xff] %v225_v8  ;;  %v247_v18 = vmul.f32 1.442695, %v225_v8  ;;  %v223_v19 = vmul.f32 1.442695, %v222_v11  ;;  %vm236_vm15 = vcmp.gt.f32.partialorder %v1425_v12, 0.0  ;;  %vm273_vm0 = vcmp.gt.f32.partialorder %v272_v15, %v270_v21 }
 0x4b6   :  { %v261_v20 = vadd.f32 -0.2, %v260_v13  ;;  %v237_v23 = vsel %vm236_vm15, %v1425_v12, 1.0  ;;  %258 = vst [vmem:[#allocation27] sm:$0xff] %v257_v16  ;;  %266 = vst [vmem:[#allocation30] sm:$0xff] %v265_v17  ;;  %v1143_v24 = vmov 0   ;;  %v274_v29 = vsel %vm273_vm0, %v272_v15, %v270_v21 }
 0x4b7   :  { %591 = vpow2.f32 %v247_v18  ;;  %v271_v25 = vsel %vm269_vm14, 1, %v1143_v24  ;;  %v284_v26 = vld [vmem:[#allocation13] sm:$0xff]  ;;  %v285_v27 = vld [vmem:[#allocation13 + $0x8] sm:$0xff]  ;;  %v289_v28 = vld [vmem:[#allocation13 + $0x10] sm:$0xff]  ;;  %s1144_s0 = smov [#allocation21]   ;;  %s753_s3 = scalar_lea.vmem %s1427_s1, 128 }
 0x4b8   :  { %s349_s29 = sshll.u32 %s1144_s0, 4  ;;  %593 = vpow2.f32 %v223_v19  ;;  %262 = vst [vmem:[#allocation29] sm:$0xff] %v261_v20  ;;  %v275_v30 = vsel %vm273_vm0, 2, %v271_v25  ;;  %v280_v31 = vld [vmem:[#allocation11 + $0x20] sm:$0xff]  ;;  %vm286_vm1 = vcmp.gt.f32.partialorder %v285_v27, %v284_v26  ;;  %p754_p2 = scmp.ne.s32.totalorder %s1427_s1, %s753_s3  ;;  %s350_s29 = int_to_ptr.vmem [resolvable:$true] %s349_s29 }
 0x4b9   :  { %p759_p4 = scmp.lt.s32.totalorder %s753_s3, %s753_s3 }
 0x4bb   :  { %p760_p5 = por %p759_p4, %p758_p3 }
 0x4bd   :  { %p761_p6 = pnand %p760_p5, %p754_p2 }
 0x4bf   :  { %764 = shalt.err (!%p761_p6)
}
 0x4c0   :  { %s765_s25 = scalar_lea.hbm %s1653_s8, 128 }
 0x4c1   :  { %p766_p7 = scmp.ne.s32.totalorder %s1653_s8, %s765_s25  ;;  %p769_p8 = scmp.lt.u32.totalorder %s765_s25, %s1653_s8 }
 0x4c3   :  { %p771_p9 = pnand %p769_p8, %p766_p7 }
 0x4c5   :  { %774 = shalt.err (!%p771_p9)
}
 0x4c6   :  { %312 = dma.vmem_to_hbm [thread:$0]  %s1427_s1, 128, %s1653_s8, [#allocation16]   ;;  %595 = vrsqrt.f32 %v237_v23  ;;  %vm277_vm2 = vcmp.gt.f32.partialorder %v276_v22, %v274_v29  ;;  %v287_v32 = vsel %vm286_vm1, %v285_v27, %v284_v26  ;;  %v288_v33 = vsel %vm286_vm1, 1, %v1143_v24 }
 0x4c7   :  { %v278_v34 = vsel %vm277_vm2, %v276_v22, %v274_v29  ;;  %v279_v35 = vsel %vm277_vm2, 3, %v275_v30  ;;  %vm290_vm3 = vcmp.gt.f32.partialorder %v289_v28, %v287_v32  ;;  %s775_s23 = scalar_lea.vmem %s350_s29, 128  ;;  %p780_p11 = scmp.lt.s32.totalorder %s350_s29, %s350_s29 }
 0x4c8   :  { %p776_p10 = scmp.ne.s32.totalorder %s350_s29, %s775_s23  ;;  %p781_p12 = scmp.lt.s32.totalorder %s775_s23, %s775_s23 }
 0x4ca   :  { %p782_p13 = por %p781_p12, %p780_p11 }
 0x4cc   :  { %p783_p0 = pnand %p782_p13, %p776_p10 }
 0x4ce   :  { %786 = shalt.err (!%p783_p0)
}
 0x4cf   :  { %s787_s8 = scalar_lea.hbm %s1657_s12, 128 }
 0x4d0   :  { %p788_p1 = scmp.ne.s32.totalorder %s1657_s12, %s787_s8  ;;  %p791_p2 = scmp.lt.u32.totalorder %s787_s8, %s1657_s12 }
 0x4d2   :  { %p793_p3 = pnand %p791_p2, %p788_p1 }
 0x4d4   :  { %796 = shalt.err (!%p793_p3)
}
 0x4d5   :  { %352 = dma.vmem_to_hbm [thread:$0]  %s350_s29, 128, %s1657_s12, [#allocation22]   ;;  %vm281_vm4 = vcmp.gt.f32.partialorder %v280_v31, %v278_v34  ;;  %v291_v36 = vsel %vm290_vm3, 2, %v288_v33 }
 0x4d6   :  { %s1145_s22 = smov [#allocation24]   ;;  %v282_v37 = vsel %vm281_vm4, 4, %v279_v35  ;;  %292 = vst [vmem:[#allocation33] sm:$0xff] %v291_v36  ;;  %s1146_s6 = smov [#allocation27]  }
 0x4d7   :  { %s369_s2 = sshll.u32 %s1145_s22, 4  ;;  %s389_s27 = sshll.u32 %s1146_s6, 4  ;;  %283 = vst [vmem:[#allocation32] sm:$0xff] %v282_v37  ;;  %s1466_s2 = int_to_ptr.vmem [resolvable:$true] %s369_s2  ;;  %s390_s27 = int_to_ptr.vmem [resolvable:$true] %s389_s27 }
 0x4d8   :  { %s797_s26 = scalar_lea.vmem %s390_s27, 128  ;;  %p802_p5 = scmp.lt.s32.totalorder %s390_s27, %s390_s27 }
 0x4d9   :  { %p798_p4 = scmp.ne.s32.totalorder %s390_s27, %s797_s26  ;;  %p803_p6 = scmp.lt.s32.totalorder %s797_s26, %s797_s26 }
 0x4db   :  { %p804_p7 = por %p803_p6, %p802_p5 }
 0x4dd   :  { %p805_p8 = pnand %p804_p7, %p798_p4 }
 0x4df   :  { %808 = shalt.err (!%p805_p8)
}
 0x4e0   :  { %s809_s24 = scalar_lea.hbm %s1661_s16, 128 }
 0x4e1   :  { %p810_p9 = scmp.ne.s32.totalorder %s1661_s16, %s809_s24  ;;  %p813_p10 = scmp.lt.u32.totalorder %s809_s24, %s1661_s16 }
 0x4e3   :  { %p815_p11 = pnand %p813_p10, %p810_p9 }
 0x4e5   :  { %818 = shalt.err (!%p815_p11)
}
 0x4e6   :  { %392 = dma.vmem_to_hbm [thread:$0]  %s390_s27, 128, %s1661_s16, [#allocation28]   ;;  %v1480_v38 = vpop.eup %591 }
 0x4e7   :  { %s1147_s3 = smov [#allocation30]   ;;  %s1148_s28 = smov [#allocation14]  }
 0x4e8   :  { %s409_s30 = sshll.u32 %s1147_s3, 4  ;;  %s299_s25 = sshll.u32 %s1148_s28, 4  ;;  %s410_s30 = int_to_ptr.vmem [resolvable:$true] %s409_s30  ;;  %s300_s25 = int_to_ptr.vmem [resolvable:$true] %s299_s25 }
 0x4e9   :  { %s819_s22 = scalar_lea.vmem %s410_s30, 128  ;;  %p824_p13 = scmp.lt.s32.totalorder %s410_s30, %s410_s30 }
 0x4ea   :  { %p820_p12 = scmp.ne.s32.totalorder %s410_s30, %s819_s22  ;;  %p825_p0 = scmp.lt.s32.totalorder %s819_s22, %s819_s22 }
 0x4ec   :  { %p826_p1 = por %p825_p0, %p824_p13 }
 0x4ee   :  { %p827_p2 = pnand %p826_p1, %p820_p12 }
 0x4f0   :  { %830 = shalt.err (!%p827_p2)
}
 0x4f1   :  { %s831_s12 = scalar_lea.hbm %s1663_s18, 128 }
 0x4f2   :  { %p832_p3 = scmp.ne.s32.totalorder %s1663_s18, %s831_s12  ;;  %p835_p4 = scmp.lt.u32.totalorder %s831_s12, %s1663_s18 }
 0x4f4   :  { %p837_p5 = pnand %p835_p4, %p832_p3 }
 0x4f6   :  { %840 = shalt.err (!%p837_p5)
}
 0x4f7   :  { %412 = dma.vmem_to_hbm [thread:$0]  %s410_s30, 128, %s1663_s18, [#allocation31]   ;;  %v1494_v39 = vpop.eup %593  ;;  %597 = vrcp.f32 %v1480_v38 }
 0x4f8   :  { %v596_v40 = vpop.eup %595  ;;  %229 = vst [vmem:[#allocation18] sm:$0xff] %v1494_v39  ;;  %s841_s21 = scalar_lea.vmem %s300_s25, 128  ;;  %p846_p7 = scmp.lt.s32.totalorder %s300_s25, %s300_s25 }
 0x4f9   :  { %p842_p6 = scmp.ne.s32.totalorder %s300_s25, %s841_s21  ;;  %p847_p8 = scmp.lt.s32.totalorder %s841_s21, %s841_s21 }
 0x4fb   :  { %p848_p9 = por %p847_p8, %p846_p7 }
 0x4fd   :  { %p849_p10 = pnand %p848_p9, %p842_p6 }
 0x4ff   :  { %852 = shalt.err (!%p849_p10)
}
 0x500   :  { %s853_s0 = scalar_lea.hbm %s1652_s7, 128 }
 0x501   :  { %p854_p11 = scmp.ne.s32.totalorder %s1652_s7, %s853_s0  ;;  %p857_p12 = scmp.lt.u32.totalorder %s853_s0, %s1652_s7 }
 0x503   :  { %p859_p13 = pnand %p857_p12, %p854_p11 }
 0x505   :  { %862 = shalt.err (!%p859_p13)
}
 0x506   :  { %302 = dma.vmem_to_hbm [thread:$0]  %s300_s25, 128, %s1652_s7, [#allocation4]   ;;  %v243_v41 = vmul.f32 %v596_v40, %v1415_v62  ;;  %v239_v42 = vmul.f32 %v596_v40, %v1417_v63 }
 0x507   :  { %s863_s26 = scalar_lea.vmem %s1433_s5, 128  ;;  %p868_p1 = scmp.lt.s32.totalorder %s1433_s5, %s1433_s5 }
 0x508   :  { %p864_p0 = scmp.ne.s32.totalorder %s1433_s5, %s863_s26  ;;  %p869_p2 = scmp.lt.s32.totalorder %s863_s26, %s863_s26 }
 0x50a   :  { %p870_p3 = por %p869_p2, %p868_p1 }
 0x50c   :  { %p871_p4 = pnand %p870_p3, %p864_p0 }
 0x50e   :  { %874 = shalt.err (!%p871_p4)
}
 0x50f   :  { %s875_s16 = scalar_lea.hbm %s1655_s10, 128 }
 0x510   :  { %p876_p5 = scmp.ne.s32.totalorder %s1655_s10, %s875_s16  ;;  %p879_p6 = scmp.lt.u32.totalorder %s875_s16, %s1655_s10 }
 0x512   :  { %p881_p7 = pnand %p879_p6, %p876_p5 }
 0x514   :  { %884 = shalt.err (!%p881_p7)
}
 0x515   :  { %332 = dma.vmem_to_hbm [thread:$0]  %s1433_s5, 128, %s1655_s10, [#allocation19]   ;;  %v244_v43 = vsel %vm236_vm15, %v243_v41, 0.0  ;;  %v240_v44 = vsel %vm236_vm15, %v239_v42, 1.0 }
 0x516   :  { %s1149_s21 = smov [#allocation17]   ;;  %s1150_s1 = smov [#allocation20]   ;;  %v245_v45 = vmul.f32 %v1494_v39, %v244_v43  ;;  %v241_v46 = vmul.f32 %v1494_v39, %v240_v44 }
 0x517   :  { %s319_s8 = sshll.u32 %s1149_s21, 4  ;;  %s339_s0 = sshll.u32 %s1150_s1, 4  ;;  %s320_s8 = int_to_ptr.vmem [resolvable:$true] %s319_s8  ;;  %s340_s0 = int_to_ptr.vmem [resolvable:$true] %s339_s0 }
 0x518   :  { %s885_s18 = scalar_lea.vmem %s320_s8, 128  ;;  %p890_p9 = scmp.lt.s32.totalorder %s320_s8, %s320_s8 }
 0x519   :  { %p886_p8 = scmp.ne.s32.totalorder %s320_s8, %s885_s18  ;;  %p891_p10 = scmp.lt.s32.totalorder %s885_s18, %s885_s18 }
 0x51b   :  { %p892_p11 = por %p891_p10, %p890_p9 }
 0x51d   :  { %p893_p12 = pnand %p892_p11, %p886_p8 }
 0x51f   :  { %896 = shalt.err (!%p893_p12)
}
 0x520   :  { %s897_s3 = scalar_lea.hbm %s1654_s9, 128 }
 0x521   :  { %p898_p13 = scmp.ne.s32.totalorder %s1654_s9, %s897_s3  ;;  %p901_p0 = scmp.lt.u32.totalorder %s897_s3, %s1654_s9 }
 0x523   :  { %p903_p1 = pnand %p901_p0, %p898_p13 }
 0x525   :  { %906 = shalt.err (!%p903_p1)
}
 0x526   :  { %322 = dma.vmem_to_hbm [thread:$0]  %s320_s8, 128, %s1654_s9, [#allocation16]   ;;  %246 = vst [vmem:[#allocation24] sm:$0xff] %v245_v45  ;;  %242 = vst [vmem:[#allocation23] sm:$0xff] %v241_v46 }
 0x527   :  { %s907_s29 = scalar_lea.vmem %s340_s0, 128  ;;  %p912_p3 = scmp.lt.s32.totalorder %s340_s0, %s340_s0 }
 0x528   :  { %p908_p2 = scmp.ne.s32.totalorder %s340_s0, %s907_s29  ;;  %p913_p4 = scmp.lt.s32.totalorder %s907_s29, %s907_s29 }
 0x52a   :  { %p914_p5 = por %p913_p4, %p912_p3 }
 0x52c   :  { %p915_p6 = pnand %p914_p5, %p908_p2 }
 0x52e   :  { %918 = shalt.err (!%p915_p6)
}
 0x52f   :  { %s919_s24 = scalar_lea.hbm %s1656_s11, 128 }
 0x530   :  { %p920_p7 = scmp.ne.s32.totalorder %s1656_s11, %s919_s24  ;;  %p923_p8 = scmp.lt.u32.totalorder %s919_s24, %s1656_s11 }
 0x532   :  { %p925_p9 = pnand %p923_p8, %p920_p7 }
 0x534   :  { %928 = shalt.err (!%p925_p9)
}
 0x535   :  { %342 = dma.vmem_to_hbm [thread:$0]  %s340_s0, 128, %s1656_s11, [#allocation19]  }
 0x536   :  { %s929_s8 = scalar_lea.vmem %s1466_s2, 128  ;;  %p934_p11 = scmp.lt.s32.totalorder %s1466_s2, %s1466_s2 }
 0x537   :  { %p930_p10 = scmp.ne.s32.totalorder %s1466_s2, %s929_s8  ;;  %p935_p12 = scmp.lt.s32.totalorder %s929_s8, %s929_s8 }
 0x539   :  { %p936_p13 = por %p935_p12, %p934_p11 }
 0x53b   :  { %p937_p0 = pnand %p936_p13, %p930_p10 }
 0x53d   :  { %940 = shalt.err (!%p937_p0)
}
 0x53e   :  { %s941_s10 = scalar_lea.hbm %s1659_s14, 128 }
 0x53f   :  { %p942_p1 = scmp.ne.s32.totalorder %s1659_s14, %s941_s10  ;;  %p945_p2 = scmp.lt.u32.totalorder %s941_s10, %s1659_s14 }
 0x541   :  { %p947_p3 = pnand %p945_p2, %p942_p1 }
 0x543   :  { %950 = shalt.err (!%p947_p3)
}
 0x544   :  { %372 = dma.vmem_to_hbm [thread:$0]  %s1466_s2, 128, %s1659_s14, [#allocation25]   ;;  %v249_v47 = vmul.f32 0.5, %v1494_v39  ;;  %v598_v48 = vpop.eup %597 }
 0x545   :  { %s1151_s22 = smov [#allocation23]   ;;  %s1152_s26 = smov [#allocation26]   ;;  %v252_v49 = vsub.f32 %v1480_v38, %v598_v48 }
 0x546   :  { %s359_s6 = sshll.u32 %s1151_s22, 4  ;;  %s379_s12 = sshll.u32 %s1152_s26, 4  ;;  %s360_s6 = int_to_ptr.vmem [resolvable:$true] %s359_s6  ;;  %s1590_s12 = int_to_ptr.vmem [resolvable:$true] %s379_s12 }
 0x547   :  { %s951_s29 = scalar_lea.vmem %s360_s6, 128  ;;  %p956_p5 = scmp.lt.s32.totalorder %s360_s6, %s360_s6 }
 0x548   :  { %p952_p4 = scmp.ne.s32.totalorder %s360_s6, %s951_s29  ;;  %p957_p6 = scmp.lt.s32.totalorder %s951_s29, %s951_s29 }
 0x54a   :  { %p958_p7 = por %p957_p6, %p956_p5 }
 0x54c   :  { %p959_p8 = pnand %p958_p7, %p952_p4 }
 0x54e   :  { %962 = shalt.err (!%p959_p8)
}
 0x54f   :  { %s963_s14 = scalar_lea.hbm %s1658_s13, 128 }
 0x550   :  { %p964_p9 = scmp.ne.s32.totalorder %s1658_s13, %s963_s14  ;;  %p967_p10 = scmp.lt.u32.totalorder %s963_s14, %s1658_s13 }
 0x552   :  { %p969_p11 = pnand %p967_p10, %p964_p9 }
 0x554   :  { %972 = shalt.err (!%p969_p11)
}
 0x555   :  { %362 = dma.vmem_to_hbm [thread:$0]  %s360_s6, 128, %s1658_s13, [#allocation22]   ;;  %v253_v50 = vmul.f32 %v252_v49, %v249_v47 }
 0x556   :  { %s1153_s4 = smov [#allocation29]   ;;  %s1154_s8 = smov [#allocation32]  }
 0x557   :  { %s399_s21 = sshll.u32 %s1153_s4, 4  ;;  %s419_s1 = sshll.u32 %s1154_s8, 4  ;;  %254 = vst [vmem:[#allocation26] sm:$0xff] %v253_v50  ;;  %s400_s21 = int_to_ptr.vmem [resolvable:$true] %s399_s21  ;;  %s420_s1 = int_to_ptr.vmem [resolvable:$true] %s419_s1 }
 0x558   :  { %s973_s18 = scalar_lea.vmem %s400_s21, 128  ;;  %p978_p13 = scmp.lt.s32.totalorder %s400_s21, %s400_s21 }
 0x559   :  { %p974_p12 = scmp.ne.s32.totalorder %s400_s21, %s973_s18  ;;  %p979_p0 = scmp.lt.s32.totalorder %s973_s18, %s973_s18 }
 0x55b   :  { %p980_p1 = por %p979_p0, %p978_p13 }
 0x55d   :  { %p981_p2 = pnand %p980_p1, %p974_p12 }
 0x55f   :  { %984 = shalt.err (!%p981_p2)
}
 0x560   :  { %s985_s13 = scalar_lea.hbm %s1662_s17, 128 }
 0x561   :  { %p986_p3 = scmp.ne.s32.totalorder %s1662_s17, %s985_s13  ;;  %p989_p4 = scmp.lt.u32.totalorder %s985_s13, %s1662_s17 }
 0x563   :  { %p991_p5 = pnand %p989_p4, %p986_p3 }
 0x565   :  { %994 = shalt.err (!%p991_p5)
}
 0x566   :  { %402 = dma.vmem_to_hbm [thread:$0]  %s400_s21, 128, %s1662_s17, [#allocation28]  }
 0x567   :  { %s995_s6 = scalar_lea.vmem %s1590_s12, 128  ;;  %p1000_p7 = scmp.lt.s32.totalorder %s1590_s12, %s1590_s12 }
 0x568   :  { %p996_p6 = scmp.ne.s32.totalorder %s1590_s12, %s995_s6  ;;  %p1001_p8 = scmp.lt.s32.totalorder %s995_s6, %s995_s6 }
 0x56a   :  { %p1002_p9 = por %p1001_p8, %p1000_p7 }
 0x56c   :  { %p1003_p10 = pnand %p1002_p9, %p996_p6 }
 0x56e   :  { %1006 = shalt.err (!%p1003_p10)
}
 0x56f   :  { %s1007_s16 = scalar_lea.hbm %s1660_s15, 128 }
 0x570   :  { %p1008_p11 = scmp.ne.s32.totalorder %s1660_s15, %s1007_s16  ;;  %p1011_p12 = scmp.lt.u32.totalorder %s1007_s16, %s1660_s15 }
 0x572   :  { %p1013_p13 = pnand %p1011_p12, %p1008_p11 }
 0x574   :  { %1016 = shalt.err (!%p1013_p13)
}
 0x575   :  { %382 = dma.vmem_to_hbm [thread:$0]  %s1590_s12, 128, %s1660_s15, [#allocation25]  }
 0x576   :  { %s1017_s25 = scalar_lea.vmem %s420_s1, 128  ;;  %p1022_p1 = scmp.lt.s32.totalorder %s420_s1, %s420_s1 }
 0x577   :  { %p1018_p0 = scmp.ne.s32.totalorder %s420_s1, %s1017_s25  ;;  %p1023_p2 = scmp.lt.s32.totalorder %s1017_s25, %s1017_s25 }
 0x579   :  { %p1024_p3 = por %p1023_p2, %p1022_p1 }
 0x57b   :  { %p1025_p4 = pnand %p1024_p3, %p1018_p0 }
 0x57d   :  { %1028 = shalt.err (!%p1025_p4)
}
 0x57e   :  { %s1029_s4 = scalar_lea.hbm %s1664_s19, 128 }
 0x57f   :  { %p1030_p5 = scmp.ne.s32.totalorder %s1664_s19, %s1029_s4  ;;  %p1033_p6 = scmp.lt.u32.totalorder %s1029_s4, %s1664_s19 }
 0x581   :  { %p1035_p7 = pnand %p1033_p6, %p1030_p5 }
 0x583   :  { %1038 = shalt.err (!%p1035_p7)
}
 0x584   :  { %422 = dma.vmem_to_hbm [thread:$0]  %s420_s1, 128, %s1664_s19, [#allocation31]  }
 0x585   :  { %s1155_s5 = smov [#allocation33]  }
 0x586   :  { %s429_s13 = sshll.u32 %s1155_s5, 4  ;;  %s430_s13 = int_to_ptr.vmem [resolvable:$true] %s429_s13 }
 0x587   :  { %s1039_s3 = scalar_lea.vmem %s430_s13, 128  ;;  %p1044_p9 = scmp.lt.s32.totalorder %s430_s13, %s430_s13 }
 0x588   :  { %p1040_p8 = scmp.ne.s32.totalorder %s430_s13, %s1039_s3  ;;  %p1045_p10 = scmp.lt.s32.totalorder %s1039_s3, %s1039_s3 }
 0x58a   :  { %p1046_p11 = por %p1045_p10, %p1044_p9 }
 0x58c   :  { %p1047_p12 = pnand %p1046_p11, %p1040_p8 }
 0x58e   :  { %1050 = shalt.err (!%p1047_p12)
}
 0x58f   :  { %s1051_s11 = scalar_lea.hbm %s1665_s20, 128 }
 0x590   :  { %p1052_p13 = scmp.ne.s32.totalorder %s1665_s20, %s1051_s11  ;;  %p1055_p0 = scmp.lt.u32.totalorder %s1051_s11, %s1665_s20 }
 0x592   :  { %p1057_p1 = pnand %p1055_p0, %p1052_p13 }
 0x594   :  { %1060 = shalt.err (!%p1057_p1)
}
 0x595   :  { %432 = dma.vmem_to_hbm [thread:$0]  %s430_s13, 128, %s1665_s20, [#allocation34]  }
 0x596   :  { %1093 = dma.done.wait [#allocation4], 128  }
 0x597   :  { %1094 = vsyncadd [#allocation4], 4294967168 }
 0x598   :  { %1095 = dma.done.wait [#allocation16], 256  }
 0x599   :  { %1096 = vsyncadd [#allocation16], 4294967040 }
 0x59a   :  { %1097 = dma.done.wait [#allocation19], 256  }
 0x59b   :  { %1098 = vsyncadd [#allocation19], 4294967040 }
 0x59c   :  { %1099 = dma.done.wait [#allocation22], 256  }
 0x59d   :  { %1100 = vsyncadd [#allocation22], 4294967040 }
 0x59e   :  { %1101 = dma.done.wait [#allocation25], 256  }
 0x59f   :  { %1102 = vsyncadd [#allocation25], 4294967040 }
 0x5a0   :  { %1103 = dma.done.wait [#allocation28], 256  }
 0x5a1   :  { %1104 = vsyncadd [#allocation28], 4294967040 }
 0x5a2   :  { %1105 = dma.done.wait [#allocation31], 256  }
 0x5a3   :  { %1106 = vsyncadd [#allocation31], 4294967040 }
 0x5a4   :  { %1107 = dma.done.wait [#allocation34], 128  }
 0x5a5   :  { %1108 = vsyncadd [#allocation34], 4294967168 }
 0x5a6   :  { %475 = vsyncpa [#allocation3], 1 }
 0x5a7   :  { %476 = vsyncpa [#allocation6], 1 }
 0x5a8   :  { %477 = vsyncpa [#allocation9], 1 }
 0x5a9   :  { %478 = vsyncpa [#allocation12], 1 }
 0x5aa   :  { %479 = vsyncpa [#allocation4], 1 }
 0x5ab   :  { %480 = vsyncpa [#allocation16], 1 }
 0x5ac   :  { %481 = vsyncpa [#allocation19], 1 }
 0x5ad   :  { %482 = vsyncpa [#allocation22], 1 }
 0x5ae   :  { %483 = vsyncpa [#allocation25], 1 }
 0x5af   :  { %484 = vsyncpa [#allocation28], 1 }
 0x5b0   :  { %485 = vsyncpa [#allocation31], 1 }
 0x5b1   :  { %486 = vsyncpa [#allocation34], 1 }

</bundles_post_ra>
